<compile_context>
chip_gen: v6e
topology: v6e:2x2x1
jax: 0.10.0
libtpu: 0.0.40
codegen_flags: <defaults>
</compile_context>

<pallas_src>
import functools

import jax
import jax.numpy as jnp
from jax.experimental import pallas as pl
from jax.experimental.pallas import tpu as pltpu


# ----------------------- fused projection + gather kernel --------------------
def _fuse_kernel(ids_ref, img_ref, w_ref, b_ref, tbl_hbm, out_ref, sem,
                 *, seq_len, window):
    """Per-batch fusion: image projection -> row 0, DMA-gathered text -> rows 1..T.

    ids_ref : SMEM [B, T] int32            (scalar prefetch: token ids)
    img_ref : VMEM [1, IN_FEAT]            image embedding for this batch elem
    w_ref   : VMEM [IN_FEAT, H]            projection weight (const index_map -> resident)
    b_ref   : VMEM [1, H]                  projection bias   (const index_map -> resident)
    tbl_hbm : HBM  [V, H]                  embedding table (memory_space=pl.ANY)
    out_ref : VMEM [1+T, H]                fused output block (batch dim squeezed)
    sem     : DMA semaphore array [window]
    """
    b = pl.program_id(0)

    def _start(t):
        tok = ids_ref[b, t]
        pltpu.make_async_copy(
            tbl_hbm.at[pl.ds(tok, 1), :],
            out_ref.at[pl.ds(t + 1, 1), :],
            sem.at[t % window],
        ).start()

    def _wait(slot):
        # All row gathers are identical (1, H) copies, so a matching-size
        # descriptor on the same semaphore slot suffices for the wait.
        pltpu.make_async_copy(
            tbl_hbm.at[pl.ds(0, 1), :],
            out_ref.at[pl.ds(1, 1), :],
            sem.at[slot],
        ).wait()

    # Rolling window of in-flight row gathers; statically unrolled so the LLO
    # scheduler can pack one descriptor per bundle on the vector-misc slot.
    for t in range(seq_len):
        if t >= window:
            _wait(t % window)
        _start(t)

    # Projected image token -> row 0, computed on the MXU while gathers fly.
    acc = jnp.dot(img_ref[...], w_ref[...],
                  preferred_element_type=jnp.float32,
                  precision=jax.lax.Precision.HIGHEST)
    out_ref[pl.ds(0, 1), :] = (acc + b_ref[...].astype(jnp.float32)).astype(out_ref.dtype)

    # Drain the remaining in-flight gathers.
    for t in range(max(0, seq_len - window), seq_len):
        _wait(t % window)


def phi_with_vision_fuse(input_ids, image_embeddings, proj_w, proj_b, emb_table,
                         attention_mask=None, labels=None, inputs_embeds=None):
    """Reproduces PhiWithVision.forward up to (and excluding) self.phi(...).

    Returns (combined_embeddings, attention_mask, labels) — exactly what the
    PyTorch module hands to the wrapped base model.
    """
    if inputs_embeds is not None:
        # PyTorch path: inputs_embeds are used as-is, mask/labels untouched.
        return inputs_embeds, attention_mask, labels

    B, T = input_ids.shape
    _, n_img, in_feat = image_embeddings.shape
    assert n_img == 1 and in_feat == proj_w.shape[0]
    H = proj_w.shape[1]
    out_dtype = emb_table.dtype
    window = max(1, min(T, 8))   # bounded outstanding-DMA depth per grid step

    ids = input_ids.astype(jnp.int32)
    itemsize = jnp.dtype(out_dtype).itemsize
    cost = pl.CostEstimate(
        flops=2 * B * in_feat * H,
        transcendentals=0,
        bytes_accessed=(B * in_feat + in_feat * H + H        # projection reads
                        + B * T * H                          # gather reads
                        + B * (1 + T) * H) * itemsize,       # fused write
    )

    # TODO(synk): for very large B*T, prefetch ids per-batch (or flatten to 1-D)
    # to control SMEM padding instead of staging the whole [B, T] matrix.
    grid_spec = pltpu.PrefetchScalarGridSpec(
        num_scalar_prefetch=1,
        grid=(B,),
        in_specs=[
            # Image embedding row for this batch element.
            pl.BlockSpec((None, 1, in_feat), lambda b, ids_ref: (b, 0, 0)),
            # Projection weight / bias: constant index_map -> fetched once,
            # VMEM-resident across the whole batch grid.
            pl.BlockSpec((in_feat, H), lambda b, ids_ref: (0, 0)),
            pl.BlockSpec((1, H), lambda b, ids_ref: (0, 0)),
            # Embedding table stays in HBM; rows are DMA-gathered in-kernel.
            pl.BlockSpec(memory_space=pl.ANY),
        ],
        out_specs=pl.BlockSpec((None, 1 + T, H), lambda b, ids_ref: (b, 0, 0)),
        scratch_shapes=[pltpu.SemaphoreType.DMA((window,))],
    )

    combined = pl.pallas_call(
        functools.partial(_fuse_kernel, seq_len=T, window=window),
        out_shape=jax.ShapeDtypeStruct((B, 1 + T, H), out_dtype),
        grid_spec=grid_spec,
        compiler_params=pltpu.CompilerParams(
            dimension_semantics=("parallel",)),  # batch iterations independent
        cost_estimate=cost,
    )(ids, image_embeddings, proj_w, proj_b.reshape(1, H), emb_table)

    # --- glue: attention mask / labels extension (matches the PyTorch code) ---
    if attention_mask is not None:
        ext = jnp.ones((attention_mask.shape[0], 1), dtype=attention_mask.dtype)
        attention_mask = jnp.concatenate([ext, attention_mask], axis=1)
    if labels is not None:
        labels = labels[:, : input_ids.shape[1]]
        img_tok_labels = jnp.full((labels.shape[0], 1), -100, dtype=labels.dtype)
        labels = jnp.concatenate([img_tok_labels, labels], axis=1)

    return combined, attention_mask, labels


# ------------------------------ reference -----------------------------------
def _reference(input_ids, image_embeddings, proj_w, proj_b, emb_table):
    projected = jnp.einsum("bnf,fh->bnh", image_embeddings, proj_w,
                           precision=jax.lax.Precision.HIGHEST) + proj_b
    text = emb_table[input_ids]
    return jnp.concatenate([projected, text], axis=1)


# -------------------------------- main ---------------------------------------
if __name__ == "__main__":
    B, T = 2, 8          # batch, text sequence length
    IN_FEAT = 512        # image_projection in_features (fixed by the module)
    H = 128              # phi.config.hidden_size (small, lane-friendly)
    V = 256              # vocab size of the embedding table

    key = jax.random.PRNGKey(0)
    k_img, k_w, k_b, k_tbl, k_ids, k_lab = jax.random.split(key, 6)

    image_embeddings = jax.random.normal(k_img, (B, 1, IN_FEAT), dtype=jnp.float32)
    proj_w = jax.random.normal(k_w, (IN_FEAT, H), dtype=jnp.float32) * 0.02
    proj_b = jax.random.normal(k_b, (H,), dtype=jnp.float32) * 0.02
    emb_table = jax.random.normal(k_tbl, (V, H), dtype=jnp.float32) * 0.02
    input_ids = jax.random.randint(k_ids, (B, T), 0, V, dtype=jnp.int32)
    attention_mask = jnp.ones((B, T), dtype=jnp.float32)
    labels = jax.random.randint(k_lab, (B, T), 0, V, dtype=jnp.int32)

    combined, new_mask, new_labels = phi_with_vision_fuse(
        input_ids, image_embeddings, proj_w, proj_b, emb_table,
        attention_mask=attention_mask, labels=labels)
    combined = jax.block_until_ready(combined)

    ref = _reference(input_ids, image_embeddings, proj_w, proj_b, emb_table)
    assert combined.shape == (B, 1 + T, H)
    assert combined.dtype == emb_table.dtype
    assert new_mask.shape == (B, 1 + T)
    assert new_labels.shape == (B, 1 + T)
    assert jnp.allclose(combined, ref, atol=1e-4, rtol=1e-4)
    assert bool(jnp.all(new_mask[:, 0] == 1.0))
    assert bool(jnp.all(new_labels[:, 0] == -100))

    print("KERNEL_OK")
</pallas_src>

<mosaic_0001>
module attributes {stable_mosaic.version = 11 : i64} {
  func.func @_fuse_kernel(%arg0: i32, %arg1: memref<2x8xi32, #tpu.memory_space<smem>>, %arg2: memref<1x1x512xf32, #tpu.memory_space<vmem>>, %arg3: memref<512x128xf32, #tpu.memory_space<vmem>>, %arg4: memref<1x128xf32, #tpu.memory_space<vmem>>, %arg5: memref<256x128xf32, #tpu.memory_space<any>>, %arg6: memref<1x9x128xf32, #tpu.memory_space<vmem>>, %arg7: memref<8x!tpu.dma_semaphore, #tpu.memory_space<semaphore_mem>>) attributes {dimension_semantics = [#tpu.dimension_semantics<parallel>], iteration_bounds = array<i64: 2>, scalar_prefetch = 1 : i64, scratch_operands = 1 : i64, tpu.core_type = #tpu.core_type<tc>, window_params = [{transform_indices = @transform_0, window_bounds = array<i64: 1, 1, 512>}, {pipeline_mode = #tpu.pipeline_mode<synchronous>, transform_indices = @transform_1, window_bounds = array<i64: 512, 128>}, {pipeline_mode = #tpu.pipeline_mode<synchronous>, transform_indices = @transform_2, window_bounds = array<i64: 1, 128>}, {}, {transform_indices = @transform_4, window_bounds = array<i64: 1, 9, 128>}]} {
    %0 = arith.index_cast %arg0 : i32 to index
    %c0 = arith.constant 0 : index
    %1 = memref.load %arg1[%0, %c0] : memref<2x8xi32, #tpu.memory_space<smem>>
    %c0_i32 = arith.constant 0 : i32
    %c0_i32_0 = arith.constant 0 : i32
    %2 = tpu.memref_slice %arg5[%1, %c0_i32_0] : memref<256x128xf32, #tpu.memory_space<any>> -> memref<1x128xf32, #tpu.memory_space<any>>
    %c0_i32_1 = arith.constant 0 : i32
    %c1_i32 = arith.constant 1 : i32
    %c0_i32_2 = arith.constant 0 : i32
    %3 = tpu.memref_slice %arg6[%c0_i32_1, %c1_i32, %c0_i32_2] : memref<1x9x128xf32, #tpu.memory_space<vmem>> -> memref<1x1x128xf32, #tpu.memory_space<vmem>>
    %4 = tpu.memref_squeeze %3 : memref<1x1x128xf32, #tpu.memory_space<vmem>> -> memref<1x128xf32, #tpu.memory_space<vmem>>
    %5 = tpu.memref_slice %arg7[%c0_i32] : memref<8x!tpu.dma_semaphore, #tpu.memory_space<semaphore_mem>> -> memref<1x!tpu.dma_semaphore, #tpu.memory_space<semaphore_mem>>
    %6 = tpu.memref_squeeze %5 : memref<1x!tpu.dma_semaphore, #tpu.memory_space<semaphore_mem>> -> memref<!tpu.dma_semaphore, #tpu.memory_space<semaphore_mem>>
    tpu.enqueue_dma source(%2 : memref<1x128xf32, #tpu.memory_space<any>>) target(%4 : memref<1x128xf32, #tpu.memory_space<vmem>>) target_semaphore(%6 : memref<!tpu.dma_semaphore, #tpu.memory_space<semaphore_mem>>)
    %7 = arith.index_cast %arg0 : i32 to index
    %c1 = arith.constant 1 : index
    %8 = memref.load %arg1[%7, %c1] : memref<2x8xi32, #tpu.memory_space<smem>>
    %c1_i32_3 = arith.constant 1 : i32
    %c0_i32_4 = arith.constant 0 : i32
    %9 = tpu.memref_slice %arg5[%8, %c0_i32_4] : memref<256x128xf32, #tpu.memory_space<any>> -> memref<1x128xf32, #tpu.memory_space<any>>
    %c0_i32_5 = arith.constant 0 : i32
    %c2_i32 = arith.constant 2 : i32
    %c0_i32_6 = arith.constant 0 : i32
    %10 = tpu.memref_slice %arg6[%c0_i32_5, %c2_i32, %c0_i32_6] : memref<1x9x128xf32, #tpu.memory_space<vmem>> -> memref<1x1x128xf32, #tpu.memory_space<vmem>>
    %11 = tpu.memref_squeeze %10 : memref<1x1x128xf32, #tpu.memory_space<vmem>> -> memref<1x128xf32, #tpu.memory_space<vmem>>
    %12 = tpu.memref_slice %arg7[%c1_i32_3] : memref<8x!tpu.dma_semaphore, #tpu.memory_space<semaphore_mem>> -> memref<1x!tpu.dma_semaphore, #tpu.memory_space<semaphore_mem>>
    %13 = tpu.memref_squeeze %12 : memref<1x!tpu.dma_semaphore, #tpu.memory_space<semaphore_mem>> -> memref<!tpu.dma_semaphore, #tpu.memory_space<semaphore_mem>>
    tpu.enqueue_dma source(%9 : memref<1x128xf32, #tpu.memory_space<any>>) target(%11 : memref<1x128xf32, #tpu.memory_space<vmem>>) target_semaphore(%13 : memref<!tpu.dma_semaphore, #tpu.memory_space<semaphore_mem>>)
    %14 = arith.index_cast %arg0 : i32 to index
    %c2 = arith.constant 2 : index
    %15 = memref.load %arg1[%14, %c2] : memref<2x8xi32, #tpu.memory_space<smem>>
    %c2_i32_7 = arith.constant 2 : i32
    %c0_i32_8 = arith.constant 0 : i32
    %16 = tpu.memref_slice %arg5[%15, %c0_i32_8] : memref<256x128xf32, #tpu.memory_space<any>> -> memref<1x128xf32, #tpu.memory_space<any>>
    %c0_i32_9 = arith.constant 0 : i32
    %c3_i32 = arith.constant 3 : i32
    %c0_i32_10 = arith.constant 0 : i32
    %17 = tpu.memref_slice %arg6[%c0_i32_9, %c3_i32, %c0_i32_10] : memref<1x9x128xf32, #tpu.memory_space<vmem>> -> memref<1x1x128xf32, #tpu.memory_space<vmem>>
    %18 = tpu.memref_squeeze %17 : memref<1x1x128xf32, #tpu.memory_space<vmem>> -> memref<1x128xf32, #tpu.memory_space<vmem>>
    %19 = tpu.memref_slice %arg7[%c2_i32_7] : memref<8x!tpu.dma_semaphore, #tpu.memory_space<semaphore_mem>> -> memref<1x!tpu.dma_semaphore, #tpu.memory_space<semaphore_mem>>
    %20 = tpu.memref_squeeze %19 : memref<1x!tpu.dma_semaphore, #tpu.memory_space<semaphore_mem>> -> memref<!tpu.dma_semaphore, #tpu.memory_space<semaphore_mem>>
    tpu.enqueue_dma source(%16 : memref<1x128xf32, #tpu.memory_space<any>>) target(%18 : memref<1x128xf32, #tpu.memory_space<vmem>>) target_semaphore(%20 : memref<!tpu.dma_semaphore, #tpu.memory_space<semaphore_mem>>)
    %21 = arith.index_cast %arg0 : i32 to index
    %c3 = arith.constant 3 : index
    %22 = memref.load %arg1[%21, %c3] : memref<2x8xi32, #tpu.memory_space<smem>>
    %c3_i32_11 = arith.constant 3 : i32
    %c0_i32_12 = arith.constant 0 : i32
    %23 = tpu.memref_slice %arg5[%22, %c0_i32_12] : memref<256x128xf32, #tpu.memory_space<any>> -> memref<1x128xf32, #tpu.memory_space<any>>
    %c0_i32_13 = arith.constant 0 : i32
    %c4_i32 = arith.constant 4 : i32
    %c0_i32_14 = arith.constant 0 : i32
    %24 = tpu.memref_slice %arg6[%c0_i32_13, %c4_i32, %c0_i32_14] : memref<1x9x128xf32, #tpu.memory_space<vmem>> -> memref<1x1x128xf32, #tpu.memory_space<vmem>>
    %25 = tpu.memref_squeeze %24 : memref<1x1x128xf32, #tpu.memory_space<vmem>> -> memref<1x128xf32, #tpu.memory_space<vmem>>
    %26 = tpu.memref_slice %arg7[%c3_i32_11] : memref<8x!tpu.dma_semaphore, #tpu.memory_space<semaphore_mem>> -> memref<1x!tpu.dma_semaphore, #tpu.memory_space<semaphore_mem>>
    %27 = tpu.memref_squeeze %26 : memref<1x!tpu.dma_semaphore, #tpu.memory_space<semaphore_mem>> -> memref<!tpu.dma_semaphore, #tpu.memory_space<semaphore_mem>>
    tpu.enqueue_dma source(%23 : memref<1x128xf32, #tpu.memory_space<any>>) target(%25 : memref<1x128xf32, #tpu.memory_space<vmem>>) target_semaphore(%27 : memref<!tpu.dma_semaphore, #tpu.memory_space<semaphore_mem>>)
    %28 = arith.index_cast %arg0 : i32 to index
    %c4 = arith.constant 4 : index
    %29 = memref.load %arg1[%28, %c4] : memref<2x8xi32, #tpu.memory_space<smem>>
    %c4_i32_15 = arith.constant 4 : i32
    %c0_i32_16 = arith.constant 0 : i32
    %30 = tpu.memref_slice %arg5[%29, %c0_i32_16] : memref<256x128xf32, #tpu.memory_space<any>> -> memref<1x128xf32, #tpu.memory_space<any>>
    %c0_i32_17 = arith.constant 0 : i32
    %c5_i32 = arith.constant 5 : i32
    %c0_i32_18 = arith.constant 0 : i32
    %31 = tpu.memref_slice %arg6[%c0_i32_17, %c5_i32, %c0_i32_18] : memref<1x9x128xf32, #tpu.memory_space<vmem>> -> memref<1x1x128xf32, #tpu.memory_space<vmem>>
    %32 = tpu.memref_squeeze %31 : memref<1x1x128xf32, #tpu.memory_space<vmem>> -> memref<1x128xf32, #tpu.memory_space<vmem>>
    %33 = tpu.memref_slice %arg7[%c4_i32_15] : memref<8x!tpu.dma_semaphore, #tpu.memory_space<semaphore_mem>> -> memref<1x!tpu.dma_semaphore, #tpu.memory_space<semaphore_mem>>
    %34 = tpu.memref_squeeze %33 : memref<1x!tpu.dma_semaphore, #tpu.memory_space<semaphore_mem>> -> memref<!tpu.dma_semaphore, #tpu.memory_space<semaphore_mem>>
    tpu.enqueue_dma source(%30 : memref<1x128xf32, #tpu.memory_space<any>>) target(%32 : memref<1x128xf32, #tpu.memory_space<vmem>>) target_semaphore(%34 : memref<!tpu.dma_semaphore, #tpu.memory_space<semaphore_mem>>)
    %35 = arith.index_cast %arg0 : i32 to index
    %c5 = arith.constant 5 : index
    %36 = memref.load %arg1[%35, %c5] : memref<2x8xi32, #tpu.memory_space<smem>>
    %c5_i32_19 = arith.constant 5 : i32
    %c0_i32_20 = arith.constant 0 : i32
    %37 = tpu.memref_slice %arg5[%36, %c0_i32_20] : memref<256x128xf32, #tpu.memory_space<any>> -> memref<1x128xf32, #tpu.memory_space<any>>
    %c0_i32_21 = arith.constant 0 : i32
    %c6_i32 = arith.constant 6 : i32
    %c0_i32_22 = arith.constant 0 : i32
    %38 = tpu.memref_slice %arg6[%c0_i32_21, %c6_i32, %c0_i32_22] : memref<1x9x128xf32, #tpu.memory_space<vmem>> -> memref<1x1x128xf32, #tpu.memory_space<vmem>>
    %39 = tpu.memref_squeeze %38 : memref<1x1x128xf32, #tpu.memory_space<vmem>> -> memref<1x128xf32, #tpu.memory_space<vmem>>
    %40 = tpu.memref_slice %arg7[%c5_i32_19] : memref<8x!tpu.dma_semaphore, #tpu.memory_space<semaphore_mem>> -> memref<1x!tpu.dma_semaphore, #tpu.memory_space<semaphore_mem>>
    %41 = tpu.memref_squeeze %40 : memref<1x!tpu.dma_semaphore, #tpu.memory_space<semaphore_mem>> -> memref<!tpu.dma_semaphore, #tpu.memory_space<semaphore_mem>>
    tpu.enqueue_dma source(%37 : memref<1x128xf32, #tpu.memory_space<any>>) target(%39 : memref<1x128xf32, #tpu.memory_space<vmem>>) target_semaphore(%41 : memref<!tpu.dma_semaphore, #tpu.memory_space<semaphore_mem>>)
    %42 = arith.index_cast %arg0 : i32 to index
    %c6 = arith.constant 6 : index
    %43 = memref.load %arg1[%42, %c6] : memref<2x8xi32, #tpu.memory_space<smem>>
    %c6_i32_23 = arith.constant 6 : i32
    %c0_i32_24 = arith.constant 0 : i32
    %44 = tpu.memref_slice %arg5[%43, %c0_i32_24] : memref<256x128xf32, #tpu.memory_space<any>> -> memref<1x128xf32, #tpu.memory_space<any>>
    %c0_i32_25 = arith.constant 0 : i32
    %c7_i32 = arith.constant 7 : i32
    %c0_i32_26 = arith.constant 0 : i32
    %45 = tpu.memref_slice %arg6[%c0_i32_25, %c7_i32, %c0_i32_26] : memref<1x9x128xf32, #tpu.memory_space<vmem>> -> memref<1x1x128xf32, #tpu.memory_space<vmem>>
    %46 = tpu.memref_squeeze %45 : memref<1x1x128xf32, #tpu.memory_space<vmem>> -> memref<1x128xf32, #tpu.memory_space<vmem>>
    %47 = tpu.memref_slice %arg7[%c6_i32_23] : memref<8x!tpu.dma_semaphore, #tpu.memory_space<semaphore_mem>> -> memref<1x!tpu.dma_semaphore, #tpu.memory_space<semaphore_mem>>
    %48 = tpu.memref_squeeze %47 : memref<1x!tpu.dma_semaphore, #tpu.memory_space<semaphore_mem>> -> memref<!tpu.dma_semaphore, #tpu.memory_space<semaphore_mem>>
    tpu.enqueue_dma source(%44 : memref<1x128xf32, #tpu.memory_space<any>>) target(%46 : memref<1x128xf32, #tpu.memory_space<vmem>>) target_semaphore(%48 : memref<!tpu.dma_semaphore, #tpu.memory_space<semaphore_mem>>)
    %49 = arith.index_cast %arg0 : i32 to index
    %c7 = arith.constant 7 : index
    %50 = memref.load %arg1[%49, %c7] : memref<2x8xi32, #tpu.memory_space<smem>>
    %c7_i32_27 = arith.constant 7 : i32
    %c0_i32_28 = arith.constant 0 : i32
    %51 = tpu.memref_slice %arg5[%50, %c0_i32_28] : memref<256x128xf32, #tpu.memory_space<any>> -> memref<1x128xf32, #tpu.memory_space<any>>
    %c0_i32_29 = arith.constant 0 : i32
    %c8_i32 = arith.constant 8 : i32
    %c0_i32_30 = arith.constant 0 : i32
    %52 = tpu.memref_slice %arg6[%c0_i32_29, %c8_i32, %c0_i32_30] : memref<1x9x128xf32, #tpu.memory_space<vmem>> -> memref<1x1x128xf32, #tpu.memory_space<vmem>>
    %53 = tpu.memref_squeeze %52 : memref<1x1x128xf32, #tpu.memory_space<vmem>> -> memref<1x128xf32, #tpu.memory_space<vmem>>
    %54 = tpu.memref_slice %arg7[%c7_i32_27] : memref<8x!tpu.dma_semaphore, #tpu.memory_space<semaphore_mem>> -> memref<1x!tpu.dma_semaphore, #tpu.memory_space<semaphore_mem>>
    %55 = tpu.memref_squeeze %54 : memref<1x!tpu.dma_semaphore, #tpu.memory_space<semaphore_mem>> -> memref<!tpu.dma_semaphore, #tpu.memory_space<semaphore_mem>>
    tpu.enqueue_dma source(%51 : memref<1x128xf32, #tpu.memory_space<any>>) target(%53 : memref<1x128xf32, #tpu.memory_space<vmem>>) target_semaphore(%55 : memref<!tpu.dma_semaphore, #tpu.memory_space<semaphore_mem>>)
    %c0_31 = arith.constant 0 : index
    %c0_32 = arith.constant 0 : index
    %c0_33 = arith.constant 0 : index
    %56 = vector.load %arg2[%c0_31, %c0_32, %c0_33] : memref<1x1x512xf32, #tpu.memory_space<vmem>>, vector<1x1x512xf32>
    %57 = vector.shape_cast %56 : vector<1x1x512xf32> to vector<1x512xf32>
    %c0_34 = arith.constant 0 : index
    %c0_35 = arith.constant 0 : index
    %58 = vector.load %arg3[%c0_34, %c0_35] : memref<512x128xf32, #tpu.memory_space<vmem>>, vector<512x128xf32>
    %cst = arith.constant dense<0.000000e+00> : vector<1x128xf32>
    %59 = tpu.matmul %57, %58, %cst {dimension_numbers = #tpu.dot_dimension_numbers<[1], [0], [0], [1], [0, 0, 1, 1], [], []>, precision = #tpu.contract_precision<fp32>} : vector<1x512xf32>, vector<512x128xf32>, vector<1x128xf32> -> vector<1x128xf32>
    %c0_36 = arith.constant 0 : index
    %c0_37 = arith.constant 0 : index
    %60 = vector.load %arg4[%c0_36, %c0_37] : memref<1x128xf32, #tpu.memory_space<vmem>>, vector<1x128xf32>
    %61 = arith.addf %59, %60 : vector<1x128xf32>
    %c0_38 = arith.constant 0 : index
    %c0_39 = arith.constant 0 : index
    %c0_40 = arith.constant 0 : index
    %62 = vector.load %arg6[%c0_38, %c0_39, %c0_40] : memref<1x9x128xf32, #tpu.memory_space<vmem>>, vector<1x1x128xf32>
    %63 = vector.shape_cast %62 : vector<1x1x128xf32> to vector<1x128xf32>
    %64 = vector.shape_cast %61 : vector<1x128xf32> to vector<1x1x128xf32>
    tpu.vector_store %arg6[%c0_38, %c0_39, %c0_40], %64 {strides = array<i32>} : memref<1x9x128xf32, #tpu.memory_space<vmem>>, vector<1x1x128xf32>,
    %c0_i32_41 = arith.constant 0 : i32
    %c0_i32_42 = arith.constant 0 : i32
    %c0_i32_43 = arith.constant 0 : i32
    %65 = tpu.memref_slice %arg5[%c0_i32_42, %c0_i32_43] : memref<256x128xf32, #tpu.memory_space<any>> -> memref<1x128xf32, #tpu.memory_space<any>>
    %c0_i32_44 = arith.constant 0 : i32
    %c1_i32_45 = arith.constant 1 : i32
    %c0_i32_46 = arith.constant 0 : i32
    %66 = tpu.memref_slice %arg6[%c0_i32_44, %c1_i32_45, %c0_i32_46] : memref<1x9x128xf32, #tpu.memory_space<vmem>> -> memref<1x1x128xf32, #tpu.memory_space<vmem>>
    %67 = tpu.memref_squeeze %66 : memref<1x1x128xf32, #tpu.memory_space<vmem>> -> memref<1x128xf32, #tpu.memory_space<vmem>>
    %68 = tpu.memref_slice %arg7[%c0_i32_41] : memref<8x!tpu.dma_semaphore, #tpu.memory_space<semaphore_mem>> -> memref<1x!tpu.dma_semaphore, #tpu.memory_space<semaphore_mem>>
    %69 = tpu.memref_squeeze %68 : memref<1x!tpu.dma_semaphore, #tpu.memory_space<semaphore_mem>> -> memref<!tpu.dma_semaphore, #tpu.memory_space<semaphore_mem>>
    tpu.wait_dma2 semaphore(%69 : memref<!tpu.dma_semaphore, #tpu.memory_space<semaphore_mem>>) src(%65 : memref<1x128xf32, #tpu.memory_space<any>>) dst(%67 : memref<1x128xf32, #tpu.memory_space<vmem>>)
    %c1_i32_47 = arith.constant 1 : i32
    %c0_i32_48 = arith.constant 0 : i32
    %c0_i32_49 = arith.constant 0 : i32
    %70 = tpu.memref_slice %arg5[%c0_i32_48, %c0_i32_49] : memref<256x128xf32, #tpu.memory_space<any>> -> memref<1x128xf32, #tpu.memory_space<any>>
    %c0_i32_50 = arith.constant 0 : i32
    %c1_i32_51 = arith.constant 1 : i32
    %c0_i32_52 = arith.constant 0 : i32
    %71 = tpu.memref_slice %arg6[%c0_i32_50, %c1_i32_51, %c0_i32_52] : memref<1x9x128xf32, #tpu.memory_space<vmem>> -> memref<1x1x128xf32, #tpu.memory_space<vmem>>
    %72 = tpu.memref_squeeze %71 : memref<1x1x128xf32, #tpu.memory_space<vmem>> -> memref<1x128xf32, #tpu.memory_space<vmem>>
    %73 = tpu.memref_slice %arg7[%c1_i32_47] : memref<8x!tpu.dma_semaphore, #tpu.memory_space<semaphore_mem>> -> memref<1x!tpu.dma_semaphore, #tpu.memory_space<semaphore_mem>>
    %74 = tpu.memref_squeeze %73 : memref<1x!tpu.dma_semaphore, #tpu.memory_space<semaphore_mem>> -> memref<!tpu.dma_semaphore, #tpu.memory_space<semaphore_mem>>
    tpu.wait_dma2 semaphore(%74 : memref<!tpu.dma_semaphore, #tpu.memory_space<semaphore_mem>>) src(%70 : memref<1x128xf32, #tpu.memory_space<any>>) dst(%72 : memref<1x128xf32, #tpu.memory_space<vmem>>)
    %c2_i32_53 = arith.constant 2 : i32
    %c0_i32_54 = arith.constant 0 : i32
    %c0_i32_55 = arith.constant 0 : i32
    %75 = tpu.memref_slice %arg5[%c0_i32_54, %c0_i32_55] : memref<256x128xf32, #tpu.memory_space<any>> -> memref<1x128xf32, #tpu.memory_space<any>>
    %c0_i32_56 = arith.constant 0 : i32
    %c1_i32_57 = arith.constant 1 : i32
    %c0_i32_58 = arith.constant 0 : i32
    %76 = tpu.memref_slice %arg6[%c0_i32_56, %c1_i32_57, %c0_i32_58] : memref<1x9x128xf32, #tpu.memory_space<vmem>> -> memref<1x1x128xf32, #tpu.memory_space<vmem>>
    %77 = tpu.memref_squeeze %76 : memref<1x1x128xf32, #tpu.memory_space<vmem>> -> memref<1x128xf32, #tpu.memory_space<vmem>>
    %78 = tpu.memref_slice %arg7[%c2_i32_53] : memref<8x!tpu.dma_semaphore, #tpu.memory_space<semaphore_mem>> -> memref<1x!tpu.dma_semaphore, #tpu.memory_space<semaphore_mem>>
    %79 = tpu.memref_squeeze %78 : memref<1x!tpu.dma_semaphore, #tpu.memory_space<semaphore_mem>> -> memref<!tpu.dma_semaphore, #tpu.memory_space<semaphore_mem>>
    tpu.wait_dma2 semaphore(%79 : memref<!tpu.dma_semaphore, #tpu.memory_space<semaphore_mem>>) src(%75 : memref<1x128xf32, #tpu.memory_space<any>>) dst(%77 : memref<1x128xf32, #tpu.memory_space<vmem>>)
    %c3_i32_59 = arith.constant 3 : i32
    %c0_i32_60 = arith.constant 0 : i32
    %c0_i32_61 = arith.constant 0 : i32
    %80 = tpu.memref_slice %arg5[%c0_i32_60, %c0_i32_61] : memref<256x128xf32, #tpu.memory_space<any>> -> memref<1x128xf32, #tpu.memory_space<any>>
    %c0_i32_62 = arith.constant 0 : i32
    %c1_i32_63 = arith.constant 1 : i32
    %c0_i32_64 = arith.constant 0 : i32
    %81 = tpu.memref_slice %arg6[%c0_i32_62, %c1_i32_63, %c0_i32_64] : memref<1x9x128xf32, #tpu.memory_space<vmem>> -> memref<1x1x128xf32, #tpu.memory_space<vmem>>
    %82 = tpu.memref_squeeze %81 : memref<1x1x128xf32, #tpu.memory_space<vmem>> -> memref<1x128xf32, #tpu.memory_space<vmem>>
    %83 = tpu.memref_slice %arg7[%c3_i32_59] : memref<8x!tpu.dma_semaphore, #tpu.memory_space<semaphore_mem>> -> memref<1x!tpu.dma_semaphore, #tpu.memory_space<semaphore_mem>>
    %84 = tpu.memref_squeeze %83 : memref<1x!tpu.dma_semaphore, #tpu.memory_space<semaphore_mem>> -> memref<!tpu.dma_semaphore, #tpu.memory_space<semaphore_mem>>
    tpu.wait_dma2 semaphore(%84 : memref<!tpu.dma_semaphore, #tpu.memory_space<semaphore_mem>>) src(%80 : memref<1x128xf32, #tpu.memory_space<any>>) dst(%82 : memref<1x128xf32, #tpu.memory_space<vmem>>)
    %c4_i32_65 = arith.constant 4 : i32
    %c0_i32_66 = arith.constant 0 : i32
    %c0_i32_67 = arith.constant 0 : i32
    %85 = tpu.memref_slice %arg5[%c0_i32_66, %c0_i32_67] : memref<256x128xf32, #tpu.memory_space<any>> -> memref<1x128xf32, #tpu.memory_space<any>>
    %c0_i32_68 = arith.constant 0 : i32
    %c1_i32_69 = arith.constant 1 : i32
    %c0_i32_70 = arith.constant 0 : i32
    %86 = tpu.memref_slice %arg6[%c0_i32_68, %c1_i32_69, %c0_i32_70] : memref<1x9x128xf32, #tpu.memory_space<vmem>> -> memref<1x1x128xf32, #tpu.memory_space<vmem>>
    %87 = tpu.memref_squeeze %86 : memref<1x1x128xf32, #tpu.memory_space<vmem>> -> memref<1x128xf32, #tpu.memory_space<vmem>>
    %88 = tpu.memref_slice %arg7[%c4_i32_65] : memref<8x!tpu.dma_semaphore, #tpu.memory_space<semaphore_mem>> -> memref<1x!tpu.dma_semaphore, #tpu.memory_space<semaphore_mem>>
    %89 = tpu.memref_squeeze %88 : memref<1x!tpu.dma_semaphore, #tpu.memory_space<semaphore_mem>> -> memref<!tpu.dma_semaphore, #tpu.memory_space<semaphore_mem>>
    tpu.wait_dma2 semaphore(%89 : memref<!tpu.dma_semaphore, #tpu.memory_space<semaphore_mem>>) src(%85 : memref<1x128xf32, #tpu.memory_space<any>>) dst(%87 : memref<1x128xf32, #tpu.memory_space<vmem>>)
    %c5_i32_71 = arith.constant 5 : i32
    %c0_i32_72 = arith.constant 0 : i32
    %c0_i32_73 = arith.constant 0 : i32
    %90 = tpu.memref_slice %arg5[%c0_i32_72, %c0_i32_73] : memref<256x128xf32, #tpu.memory_space<any>> -> memref<1x128xf32, #tpu.memory_space<any>>
    %c0_i32_74 = arith.constant 0 : i32
    %c1_i32_75 = arith.constant 1 : i32
    %c0_i32_76 = arith.constant 0 : i32
    %91 = tpu.memref_slice %arg6[%c0_i32_74, %c1_i32_75, %c0_i32_76] : memref<1x9x128xf32, #tpu.memory_space<vmem>> -> memref<1x1x128xf32, #tpu.memory_space<vmem>>
    %92 = tpu.memref_squeeze %91 : memref<1x1x128xf32, #tpu.memory_space<vmem>> -> memref<1x128xf32, #tpu.memory_space<vmem>>
    %93 = tpu.memref_slice %arg7[%c5_i32_71] : memref<8x!tpu.dma_semaphore, #tpu.memory_space<semaphore_mem>> -> memref<1x!tpu.dma_semaphore, #tpu.memory_space<semaphore_mem>>
    %94 = tpu.memref_squeeze %93 : memref<1x!tpu.dma_semaphore, #tpu.memory_space<semaphore_mem>> -> memref<!tpu.dma_semaphore, #tpu.memory_space<semaphore_mem>>
    tpu.wait_dma2 semaphore(%94 : memref<!tpu.dma_semaphore, #tpu.memory_space<semaphore_mem>>) src(%90 : memref<1x128xf32, #tpu.memory_space<any>>) dst(%92 : memref<1x128xf32, #tpu.memory_space<vmem>>)
    %c6_i32_77 = arith.constant 6 : i32
    %c0_i32_78 = arith.constant 0 : i32
    %c0_i32_79 = arith.constant 0 : i32
    %95 = tpu.memref_slice %arg5[%c0_i32_78, %c0_i32_79] : memref<256x128xf32, #tpu.memory_space<any>> -> memref<1x128xf32, #tpu.memory_space<any>>
    %c0_i32_80 = arith.constant 0 : i32
    %c1_i32_81 = arith.constant 1 : i32
    %c0_i32_82 = arith.constant 0 : i32
    %96 = tpu.memref_slice %arg6[%c0_i32_80, %c1_i32_81, %c0_i32_82] : memref<1x9x128xf32, #tpu.memory_space<vmem>> -> memref<1x1x128xf32, #tpu.memory_space<vmem>>
    %97 = tpu.memref_squeeze %96 : memref<1x1x128xf32, #tpu.memory_space<vmem>> -> memref<1x128xf32, #tpu.memory_space<vmem>>
    %98 = tpu.memref_slice %arg7[%c6_i32_77] : memref<8x!tpu.dma_semaphore, #tpu.memory_space<semaphore_mem>> -> memref<1x!tpu.dma_semaphore, #tpu.memory_space<semaphore_mem>>
    %99 = tpu.memref_squeeze %98 : memref<1x!tpu.dma_semaphore, #tpu.memory_space<semaphore_mem>> -> memref<!tpu.dma_semaphore, #tpu.memory_space<semaphore_mem>>
    tpu.wait_dma2 semaphore(%99 : memref<!tpu.dma_semaphore, #tpu.memory_space<semaphore_mem>>) src(%95 : memref<1x128xf32, #tpu.memory_space<any>>) dst(%97 : memref<1x128xf32, #tpu.memory_space<vmem>>)
    %c7_i32_83 = arith.constant 7 : i32
    %c0_i32_84 = arith.constant 0 : i32
    %c0_i32_85 = arith.constant 0 : i32
    %100 = tpu.memref_slice %arg5[%c0_i32_84, %c0_i32_85] : memref<256x128xf32, #tpu.memory_space<any>> -> memref<1x128xf32, #tpu.memory_space<any>>
    %c0_i32_86 = arith.constant 0 : i32
    %c1_i32_87 = arith.constant 1 : i32
    %c0_i32_88 = arith.constant 0 : i32
    %101 = tpu.memref_slice %arg6[%c0_i32_86, %c1_i32_87, %c0_i32_88] : memref<1x9x128xf32, #tpu.memory_space<vmem>> -> memref<1x1x128xf32, #tpu.memory_space<vmem>>
    %102 = tpu.memref_squeeze %101 : memref<1x1x128xf32, #tpu.memory_space<vmem>> -> memref<1x128xf32, #tpu.memory_space<vmem>>
    %103 = tpu.memref_slice %arg7[%c7_i32_83] : memref<8x!tpu.dma_semaphore, #tpu.memory_space<semaphore_mem>> -> memref<1x!tpu.dma_semaphore, #tpu.memory_space<semaphore_mem>>
    %104 = tpu.memref_squeeze %103 : memref<1x!tpu.dma_semaphore, #tpu.memory_space<semaphore_mem>> -> memref<!tpu.dma_semaphore, #tpu.memory_space<semaphore_mem>>
    tpu.wait_dma2 semaphore(%104 : memref<!tpu.dma_semaphore, #tpu.memory_space<semaphore_mem>>) src(%100 : memref<1x128xf32, #tpu.memory_space<any>>) dst(%102 : memref<1x128xf32, #tpu.memory_space<vmem>>)
    return
  }
  func.func @transform_0(%arg0: i32, %arg1: memref<2x8xi32, #tpu.memory_space<smem>>) -> (i32, i32, i32) {
    %c0_i32 = arith.constant 0 : i32
    %c0_i32_0 = arith.constant 0 : i32
    %c0_i32_1 = arith.constant 0 : i32
    return %arg0, %c0_i32, %c0_i32_0 : i32, i32, i32
  }
  func.func @transform_1(%arg0: i32, %arg1: memref<2x8xi32, #tpu.memory_space<smem>>) -> (i32, i32) {
    %c0_i32 = arith.constant 0 : i32
    %c0_i32_0 = arith.constant 0 : i32
    %c0_i32_1 = arith.constant 0 : i32
    return %c0_i32, %c0_i32_0 : i32, i32
  }
  func.func @transform_2(%arg0: i32, %arg1: memref<2x8xi32, #tpu.memory_space<smem>>) -> (i32, i32) {
    %c0_i32 = arith.constant 0 : i32
    %c0_i32_0 = arith.constant 0 : i32
    %c0_i32_1 = arith.constant 0 : i32
    return %c0_i32, %c0_i32_0 : i32, i32
  }
  func.func @transform_4(%arg0: i32, %arg1: memref<2x8xi32, #tpu.memory_space<smem>>) -> (i32, i32, i32) {
    %c0_i32 = arith.constant 0 : i32
    %c0_i32_0 = arith.constant 0 : i32
    %c0_i32_1 = arith.constant 0 : i32
    return %arg0, %c0_i32, %c0_i32_0 : i32, i32, i32
  }
}

</mosaic_0001>

<bundles_post_ra>
// kernel: tpu_custom_call.1
= control target key start
LH: loop header
LB: loop body
LE: loop exit
PB: predicated region body
PF: predicated region fallthrough
CT: control target
= control target key end

     0   :  { %s3124_s18 = smov [#allocation4]   ;;  %s4620_s0 = inlined_call_operand.hbm [shape: s32[2,8], index: 0, kind: input, shape index: {}]   ;;  %s4621_s1 = inlined_call_operand.hbm [shape: f32[2,1,512], index: 1, kind: input, shape index: {}]   ;;  %s4622_s2 = inlined_call_operand.hbm [shape: f32[512,128], index: 2, kind: input, shape index: {}]   ;;  %s4623_s3 = inlined_call_operand.vmem [shape: f32[1,128], index: 3, kind: input, shape index: {}]   ;;  %s4624_s4 = inlined_call_operand.hbm [shape: f32[256,128], index: 4, kind: input, shape index: {}]   ;;  %s4625_s5 = inlined_call_operand.vmem [shape: f32[2,9,128], index: 5, kind: output, shape index: {}]  }
   0x1   :  { %11 = dma.hbm_to_smem %s4620_s0, 32, %s3124_s18, [#allocation3] }
   0x2   :  { %3082 = dma.done.wait [#allocation3], 32 }
   0x3   :  { %3083 = vsyncadd [#allocation3], 4294967264 }
   0x4   :  { %13 = sfence }
   0x5   :  { %14 = vsyncpa [#allocation6], 0 }
   0x6   :  { %16 = vsyncpa [#allocation6 + $0x1], 0 }
   0x7   :  { %17 = vsyncpa [#allocation8], 0  ;;  %s3162_s21 = smov 0   ;;  %s3164_s22 = smov 0  }
   0x8   :  { %s3166_s23 = smov 0   ;;  %s3168_s24 = smov 0  }
   0x9 LB: > { %s3181_s0 = sadd.s32 4294967295, %s3122_s24   ;;  %p43_p0 = scmp.ne.s32.totalorder %s3114_s22, %s3110_s21  ;;  %s3122_s24 = sphi %s3168_s24, %s4996_s24   ;;  %s3118_s23 = sphi %s3166_s23, %s4995_s23   ;;  %s3114_s22 = sphi %s3164_s22, %s4994_s22   ;;  %s3110_s21 = sphi %s3162_s21, %s4993_s21  }
   0xa   : > { %p4626_p1 = scmp.eq.s32.totalorder %s3181_s0, 0  ;;  %p2323_p2 = scmp.ge.s32.totalorder %s3122_s24, 1 }
   0xb   : > { %p122_p3 = scmp.lt.s32.totalorder %s3122_s24, 3  ;;  %s3125_s27 = smov [#allocation7]  }
   0xc   : > { %p3189_p4 = por %p4626_p1, %p43_p0  ;;  %s134_s28 = sshll.u32 %s3125_s27, 4  ;;  %s135_s28 = int_to_ptr.vmem [resolvable:$true] %s134_s28 }
   0xd   : > { %p3193_p5 = pnand %p2323_p2, %p122_p3  ;;  %s3206_s30 = sadd.s32 1, %s3122_s24  }
   0xe   : > { %s4762_s25 = scalar_select %p3189_p4, 1, 0 }
   0xf   : > { %s4763_s26 = scalar_select %p3193_p5, 1, 0 }
  0x10   : > { %p2781_p6 = pneg %p3193_p5  ;;  %s30_s6 = sadd.s32 1, %s3118_s23 }
  0x11   : > { %s27_s7 = ssub.s32 %s3122_s24, %s3206_s30  ;;  %s2847_s8 = scalar_lea.vmem %s135_s28, 8192 }
  0x12   : > { %p3201_p7 = pnand %p2781_p6, %p4626_p1  ;;  %p2848_p9 = scmp.ne.s32.totalorder %s135_s28, %s2847_s8 }
  0x13   : > { %p2855_p12 = scmp.lt.s32.totalorder %s135_s28, %s135_s28  ;;  %p2856_p13 = scmp.lt.s32.totalorder %s2847_s8, %s2847_s8 }
  0x14   : > { %p2838_p8 = pneg %p3201_p7 }
  0x15   : > { %p2857_p0 = por %p2856_p13, %p2855_p12 }
  0x16   : > { %p2850_p10 = pnand %p2848_p9, %p2838_p8 }
  0x18   : > { %p2851_p11 = pneg %p2850_p10 }
  0x1a   : > { %p2858_p2 = pnand %p2857_p0, %p2851_p11 }
  0x1c   : > { %2861 = shalt.err (!%p2858_p2)
}
  0x1d   : > { %s3126_s9 = smov 128   ;;  %s3127_s10 = smov 8  }
  0x1e   : > { %2784 = dma.hbm_to_vmem [thread:$0]  (!%p3201_p7), %s4622_s2, 8192, %s135_s28, [#allocation8], %s3126_s9, %s3126_s9, %s3127_s10  }
  0x1f   : > { %p28_p3 = scmp.eq.s32.totalorder %s27_s7, 0  ;;  %p37_p6 = scmp.ne.s32.totalorder %s3118_s23, %s3114_s22 }
  0x20   : > { %p38_p8 = scmp.eq.s32.totalorder %s3122_s24, 0  ;;  %p2790_p9 = scmp.lt.s32.totalorder %s3122_s24, 2 }
  0x21   : > { %s3223_s13 = scalar_select %p28_p3, %s3118_s23, %s30_s6  }
  0x22   : > { %p39_p10 = por %p38_p8, %p37_p6  ;;  %s151_s14 = sand.u32 1, %s3118_s23  }
  0x23   : > { %s2326_s15 = sshll.u32 %s151_s14, 2  ;;  %s2353_s16 = sshll.u32 %s3122_s24, 6 }
  0x24   : > { %s3230_s19 = scalar_lea.hbm %s4621_s1, %s2353_s16  ;;  %s155_s20 = scalar_lea.vmem [#allocation5], %s2326_s15 }
  0x25   : > { %s163_s21 = sshll.u32 %s155_s20, 4  ;;  %p3232_p7 = pnand %p2790_p9, %p39_p10  ;;  %s164_s21 = int_to_ptr.vmem [resolvable:$true] %s163_s21 }
  0x26   : > { %s152_s28 = scalar_lea.sflag [#allocation6], %s151_s14  ;;  %s2862_s29 = scalar_lea.hbm %s3230_s19, 64 }
  0x27   : > { %p2863_p11 = scmp.ne.s32.totalorder %s3230_s19, %s2862_s29  ;;  %p2864_p12 = pneg %p3232_p7 }
  0x28   : > { %s2867_s7 = scalar_lea.hbm %s4621_s1, 128  ;;  %p2868_p2 = scmp.lt.s32.totalorder %s3230_s19, %s4621_s1 }
  0x29   : > { %p2865_p13 = pnand %p2864_p12, %p2863_p11  ;;  %p2869_p3 = scmp.lt.s32.totalorder %s2867_s7, %s2862_s29 }
  0x2b   : > { %p2866_p0 = pneg %p2865_p13  ;;  %p2870_p6 = por %p2869_p3, %p2868_p2 }
  0x2d   : > { %p2871_p8 = pnand %p2870_p6, %p2866_p0 }
  0x2f   : > { %2874 = shalt.err (!%p2871_p8)
}
  0x30   : > { %s2875_s10 = scalar_lea.vmem %s164_s21, 64  ;;  %s3128_s11 = smov [#allocation5]  }
  0x31   : > { %p2876_p9 = scmp.ne.s32.totalorder %s164_s21, %s2875_s10  ;;  %s2880_s12 = sshll.u32 %s3128_s11, 4  ;;  %s2881_s12 = int_to_ptr.vmem [resolvable:$false] %s2880_s12 }
  0x32   : > { %s2882_s14 = scalar_lea.vmem %s2881_s12, 128  ;;  %p2883_p11 = scmp.lt.s32.totalorder %s164_s21, %s2881_s12 }
  0x33   : > { %p2878_p10 = pnand %p2876_p9, %p2864_p12  ;;  %p2884_p13 = scmp.lt.s32.totalorder %s2882_s14, %s2875_s10 }
  0x35   : > { %p2879_p1 = pneg %p2878_p10  ;;  %p2885_p4 = por %p2884_p13, %p2883_p11 }
  0x37   : > { %p2886_p5 = pnand %p2885_p4, %p2879_p1 }
  0x39   : > { %2889 = shalt.err (!%p2886_p5)
}
  0x3a   : > { %2788 = dma.hbm_to_vmem [thread:$0]  (!%p3232_p7), %s3230_s19, 64, %s164_s21, %s152_s28  }
  0x3b   : > { %p4766_p0 = scmp.ne.s32.totalorder %s4763_s26, 0 }
  0x3d   : > { %172 = sbr.rel (%p4766_p0) target bundleno = 512 (0x200), region = 32 }
  0x42   : > { %s174_s15 = sand.u32 1, %s3114_s22   ;;  %p4767_p12 = scmp.ne.s32.totalorder %s4762_s25, 0 }
  0x43   : > { %s3253_s16 = sshll.u32 %s174_s15, 2  ;;  %s175_s17 = scalar_lea.sflag [#allocation6], %s174_s15 }
  0x44   : > { %s178_s18 = scalar_lea.vmem [#allocation5], %s3253_s16 }
  0x45   : > { %3085 = dma.done.wait (%p4767_p12), %s175_s17, 64  }
  0x46   : > { %3087 = vsyncadd (%p4767_p12), %s175_s17, 4294967232  ;;  %p4768_p1 = scmp.eq.s32.totalorder %s3181_s0, 0 }
  0x48   : > { %3089 = dma.done.wait (%p4768_p1), [#allocation8], 8192   ;;  %p4769_p4 = pmov %p4768_p1 }
  0x49   : > { %v412_v0 = vlaneseq  ;;  %v377_v2 = vld [vmem:[#allocation7 + $0xf8] sm:$0xff]  ;;  %v376_v4 = vld [vmem:[#allocation7 + $0xf0] sm:$0xff]  ;;  %v375_v11 = vld [vmem:[#allocation7 + $0xe8] sm:$0xff]  ;;  %p205_p5 = scmp.lt.s32.totalorder %s3181_s0, 1  ;;  %s4477_s25 = sshll.u32 %s3181_s0, 7 }
  0x4a   : > { %3091 = vsyncadd (%p4769_p4), [#allocation8], 4294959104  ;;  %v361_v3 = vld [vmem:[#allocation7 + $0x78] sm:$0xff]  ;;  %v3268_v7 = vand.u32 4294901760, %v377_v2  ;;  %v3272_v9 = vand.u32 4294901760, %v376_v4  ;;  %v360_v10 = vld [vmem:[#allocation7 + $0x70] sm:$0xff] }
  0x4b   : > { %v3264_v1 = vshrl.u32 %v412_v0, 7  ;;  %v3270_v8 = vand.u32 4294901760, %v361_v3  ;;  %v359_v12 = vld [vmem:[#allocation7 + $0x68] sm:$0xff]  ;;  %v3274_v13 = vand.u32 4294901760, %v360_v10  ;;  %v3276_v14 = vand.u32 4294901760, %v375_v11  ;;  %v374_v16 = vld [vmem:[#allocation7 + $0xe0] sm:$0xff] }
  0x4c   : > { %v3278_v15 = vand.u32 4294901760, %v359_v12  ;;  %v358_v17 = vld [vmem:[#allocation7 + $0x60] sm:$0xff]  ;;  %v373_v18 = vld [vmem:[#allocation7 + $0xd8] sm:$0xff]  ;;  %2355 = vmatprep.subr.mxu0 %v3268_v7  ;;  %v3281_v19 = vand.u32 4294901760, %v374_v16  ;;  %v3288_v22 = vsub.f32 %v377_v2, %v3268_v7  ;;  %v3292_v24 = vld [vmem:[#allocation7 + $0xd0] sm:$0xff]  ;;  %v3307_v29 = vsub.f32 %v376_v4, %v3272_v9  ;;  %s211_s26 = sld [smem:[#allocation4 + %s4477_s25]] }
  0x4d   : > { %4770 = vst [vmem:[#allocation38_spill] sm:$0xff] %v3264_v1  ;;  %v3283_v20 = vand.u32 4294901760, %v358_v17  ;;  %v3285_v21 = vand.u32 4294901760, %v373_v18  ;;  %v3290_v23 = vld [vmem:[#allocation7 + $0x58] sm:$0xff]  ;;  %v3294_v25 = vld [vmem:[#allocation7 + $0x50] sm:$0xff]  ;;  %2356 = vmatpush3.msra.mxu0 %v3270_v8  ;;  %v3301_v27 = vsub.f32 %v361_v3, %v3270_v8  ;;  %v3304_v28 = vand.u32 4294901760, %v3292_v24 }
  0x4e   : > { %v3298_v26 = vand.u32 4294901760, %v3290_v23  ;;  %v3309_v30 = vld [vmem:[#allocation7 + $0xc8] sm:$0xff]  ;;  %v3313_v32 = vld [vmem:[#allocation7 + $0xc0] sm:$0xff]  ;;  %2357 = vmatprep.subr.mxu0 %v3272_v9  ;;  %v4640_v33 = vand.u32 4294901760, %v3288_v22  ;;  %v3318_v34 = vand.u32 4294901760, %v3294_v25  ;;  %v3321_v35 = vsub.f32 %v360_v10, %v3274_v13  ;;  %v3359_v50 = vld [vmem:[#allocation7 + $0xb8] sm:$0xff] }
  0x4f   : > { %v3311_v31 = vld [vmem:[#allocation7 + $0x48] sm:$0xff]  ;;  %v3324_v36 = vand.u32 4294901760, %v3309_v30  ;;  %2358 = vmatpush3.msra.mxu0 %v3274_v13  ;;  %v4638_v37 = vand.u32 4294901760, %v3301_v27  ;;  %v4637_v38 = vand.u32 4294901760, %v3307_v29  ;;  %v3330_v39 = vsub.f32 %v375_v11, %v3276_v14  ;;  %v3335_v41 = vld [vmem:[#allocation7 + $0x40] sm:$0xff]  ;;  %v3369_v55 = vld [vmem:[#allocation7 + $0x38] sm:$0xff] }
  0x50   : > { %4771 = vst [vmem:[#allocation39_spill] sm:$0xff] %v3318_v34  ;;  %v3333_v40 = vand.u32 4294901760, %v3311_v31  ;;  %2359 = vmatprep.subr.mxu0 %v3276_v14  ;;  %v660_v42 = vsub.f32 %v3288_v22, %v4640_v33  ;;  %v4635_v43 = vand.u32 4294901760, %v3321_v35  ;;  %v3343_v44 = vsub.f32 %v359_v12, %v3278_v15  ;;  %v3376_v60 = vld [vmem:[#allocation7 + $0xb0] sm:$0xff]  ;;  %v3400_v12 = vld [vmem:[#allocation7 + $0xa8] sm:$0xff]  ;;  %s226_s19 = sadd.s32 1, %s4477_s25 }
  0x51   : > { %4772 = vst [vmem:[#allocation40_spill] sm:$0xff] %v3324_v36  ;;  %v3346_v45 = vand.u32 4294901760, %v3313_v32  ;;  %2360 = vmatpush3.msra.mxu0 %v3278_v15  ;;  %v548_v46 = vsub.f32 %v3301_v27, %v4638_v37  ;;  %v667_v47 = vsub.f32 %v3307_v29, %v4637_v38  ;;  %v4633_v48 = vand.u32 4294901760, %v3330_v39  ;;  %v3388_v2 = vld [vmem:[#allocation7 + $0x30] sm:$0xff]  ;;  %v3478_v38 = vld [vmem:[#allocation7 + $0x18] sm:$0xff]  ;;  %s4998_s0 = smov (!%p205_p5, %s3181_s0), 1 }
  0x52   : > { %4773 = vst [vmem:[#allocation41_spill] sm:$0xff] %v3333_v40  ;;  %v3357_v49 = vsub.f32 %v374_v16, %v3281_v19  ;;  %2361 = vmatprep.subr.mxu0 %v3281_v19  ;;  %v661_v51 = vand.u32 4294901760, %v660_v42  ;;  %v555_v52 = vsub.f32 %v3321_v35, %v4635_v43  ;;  %v4632_v53 = vand.u32 4294901760, %v3343_v44  ;;  %v3491_v33 = vld [vmem:[#allocation7 + $0x90] sm:$0xff]  ;;  %s4482_s20 = sld [smem:[#allocation4 + %s226_s19]]  ;;  %s243_s21 = sadd.s32 2, %s4477_s25 }
  0x53   : > { %4774 = vst [vmem:[#allocation42_spill] sm:$0xff] %v3346_v45  ;;  %v3367_v54 = vand.u32 4294901760, %v3335_v41  ;;  %2362 = vmatpush3.msra.mxu0 %v3283_v20  ;;  %v549_v56 = vand.u32 4294901760, %v548_v46  ;;  %v668_v57 = vand.u32 4294901760, %v667_v47  ;;  %v674_v58 = vsub.f32 %v3330_v39, %v4633_v48  ;;  %v3501_v6 = vld [vmem:[#allocation7 + $0x10] sm:$0xff]  ;;  %s2354_s27 = sshll.u32 %s4998_s0, 4 }
  0x54   : > { %v4630_v59 = vand.u32 4294901760, %v3357_v49  ;;  %2363 = vmatprep.subr.mxu0 %v3285_v21  ;;  %2390 = vmatprep.subr.mxu1 %v661_v51  ;;  %v556_v61 = vand.u32 4294901760, %v555_v52  ;;  %v562_v62 = vsub.f32 %v3343_v44, %v4632_v53  ;;  %v3383_v63 = vsub.f32 %v358_v17, %v3283_v20  ;;  %v3457_v53 = vld [vmem:[#allocation7 + $0x20] sm:$0xff]  ;;  %s4485_s28 = sld [smem:[#allocation4 + %s243_s21]]  ;;  %s4490_s6 = scalar_lea.vmem %s4625_s5, %s2354_s27 }
  0x55   : > { %4775 = vst [vmem:[#allocation43_spill] sm:$0xff] %v3367_v54  ;;  %v3386_v0 = vand.u32 4294901760, %v3359_v50  ;;  %2364 = vmatpush3.msra.mxu0 %v3298_v26  ;;  %2391 = vmatpush3.msra.mxu1 %v549_v56  ;;  %v675_v3 = vand.u32 4294901760, %v674_v58  ;;  %v3395_v10 = vsub.f32 %v373_v18, %v3285_v21  ;;  %v3398_v11 = vand.u32 4294901760, %v3369_v55  ;;  %v3411_v18 = vld [vmem:[#allocation7 + $0x28] sm:$0xff]  ;;  %s260_s7 = sadd.s32 3, %s4477_s25 }
  0x56   : > { %v681_v4 = vsub.f32 %v3357_v49, %v4630_v59  ;;  %2365 = vmatprep.subr.mxu0 %v3304_v28  ;;  %2392 = vmatprep.subr.mxu1 %v668_v57  ;;  %v563_v16 = vand.u32 4294901760, %v562_v62  ;;  %v4629_v17 = vand.u32 4294901760, %v3383_v63  ;;  %v3406_v42 = vsub.f32 %v3290_v23, %v3298_v26  ;;  %s214_s8 = scalar_lea.vmem %s4490_s6, 1  ;;  %s230_s9 = scalar_lea.vmem %s4490_s6, 2 }
  0x57   : > { %4776 = vst [vmem:[#allocation44_spill] sm:$0xff] %v3386_v0  ;;  %4777 = vst [vmem:[#allocation45_spill] sm:$0xff] %v3398_v11  ;;  %v3409_v46 = vand.u32 4294901760, %v3376_v60  ;;  %2366 = vmatpush3.msra.mxu0 %v3318_v34  ;;  %2393 = vmatpush3.msra.mxu1 %v556_v61  ;;  %v4631_v51 = vand.u32 4294901760, %v3395_v10  ;;  %v3417_v52 = vsub.f32 %v3292_v24, %v3304_v28  ;;  %v3420_v56 = vand.u32 4294901760, %v3388_v2  ;;  %v3434_v24 = vld [vmem:[#allocation7 + $0xa0] sm:$0xff] }
  0x58   : > { %v682_v47 = vand.u32 4294901760, %v681_v4  ;;  %2367 = vmatprep.subr.mxu0 %v3324_v36  ;;  %2394 = vmatprep.subr.mxu1 %v675_v3  ;;  %v569_v23 = vsub.f32 %v3383_v63, %v4629_v17  ;;  %v4634_v57 = vand.u32 4294901760, %v3406_v42  ;;  %v3429_v58 = vsub.f32 %v3294_v25, %v3318_v34  ;;  %s2335_s10 = sshll.u32 %s211_s26, 4  ;;  %s222_s11 = sshll.u32 %s214_s8, 4  ;;  %s223_s11 = int_to_ptr.vmem [resolvable:$true] %s222_s11 }
  0x59   : > { %4778 = vst [vmem:[#allocation46_spill] sm:$0xff] %v3409_v46  ;;  %4779 = vst [vmem:[#allocation47_spill] sm:$0xff] %v3420_v56  ;;  %v3432_v61 = vand.u32 4294901760, %v3400_v12  ;;  %2368 = vmatpush3.msra.mxu0 %v3333_v40  ;;  %2395 = vmatpush3.msra.mxu1 %v563_v16  ;;  %v688_v62 = vsub.f32 %v3395_v10, %v4631_v51  ;;  %v4636_v3 = vand.u32 4294901760, %v3417_v52  ;;  %v3446_v25 = vand.u32 4294901760, %v3411_v18  ;;  %s213_s15 = scalar_lea.hbm %s4624_s4, %s2335_s10 }
  0x5a   : > { %v3443_v4 = vsub.f32 %v3309_v30, %v3324_v36  ;;  %2369 = vmatprep.subr.mxu0 %v3346_v45  ;;  %2396 = vmatprep.subr.mxu1 %v682_v47  ;;  %v570_v17 = vand.u32 4294901760, %v569_v23  ;;  %v576_v16 = vsub.f32 %v3406_v42, %v4634_v57  ;;  %v4639_v59 = vand.u32 4294901760, %v3429_v58  ;;  %v3467_v57 = vld [vmem:[#allocation7 + $0x98] sm:$0xff]  ;;  %s2890_s0 = scalar_lea.hbm %s213_s15, 16  ;;  %p2893_p2 = scmp.lt.s32.totalorder %s213_s15, %s4624_s4 }
  0x5b   : > { %4780 = vst [vmem:[#allocation48_spill] sm:$0xff] %v3432_v61  ;;  %4781 = vst [vmem:[#allocation49_spill] sm:$0xff] %v3446_v25  ;;  %v3455_v51 = vsub.f32 %v3311_v31, %v3333_v40  ;;  %2370 = vmatpush3.msra.mxu0 %v3367_v54  ;;  %v689_v30 = vand.u32 4294901760, %v688_v62  ;;  %v695_v47 = vsub.f32 %v3417_v52, %v4636_v3  ;;  %v3465_v48 = vand.u32 4294901760, %v3434_v24  ;;  %v3583_v36 = vld [vmem:[%s178_s18] sm:$0xf]  ;;  %p2891_p7 = scmp.ne.s32.totalorder %s213_s15, %s2890_s0 }
  0x5c   : > { %v4641_v23 = vand.u32 4294901760, %v3443_v4  ;;  %2397 = vmatpush3.msra.mxu1 %v570_v17  ;;  %2371 = vmatprep.subr.mxu0 %v3386_v0  ;;  %v577_v31 = vand.u32 4294901760, %v576_v16  ;;  %v583_v43 = vsub.f32 %v3429_v58, %v4639_v59  ;;  %v3476_v3 = vsub.f32 %v3313_v32, %v3346_v45  ;;  %4795 = vst [vmem:[#allocation59_spill] sm:$0xff] %v3583_v36  ;;  %s4501_s18 = scalar_lea.hbm %s4624_s4, 4096 }
  0x5d   : > { %4782 = vst [vmem:[#allocation50_spill] sm:$0xff] %v3465_v48  ;;  %v4642_v62 = vand.u32 4294901760, %v3455_v51  ;;  %2398 = vmatprep.subr.mxu1 %v689_v30  ;;  %2372 = vmatpush3.msra.mxu0 %v3398_v11  ;;  %v696_v37 = vand.u32 4294901760, %v695_v47  ;;  %v3485_v16 = vand.u32 4294901760, %v3457_v53  ;;  %v3489_v59 = vsub.f32 %v3335_v41, %v3367_v54  ;;  %p2894_p3 = scmp.lt.s32.totalorder %s4501_s18, %s2890_s0 }
  0x5e   : > { %v702_v17 = vsub.f32 %v3443_v4, %v4641_v23  ;;  %2399 = vmatpush3.msra.mxu1 %v577_v31  ;;  %2373 = vmatprep.subr.mxu0 %v3409_v46  ;;  %v584_v32 = vand.u32 4294901760, %v583_v43  ;;  %v3499_v23 = vand.u32 4294901760, %v3467_v57  ;;  %v3507_v43 = vsub.f32 %v3359_v50, %v3386_v0 }
  0x5f   : > { %4783 = vst [vmem:[#allocation51_spill] sm:$0xff] %v3485_v16  ;;  %v590_v30 = vsub.f32 %v3455_v51, %v4642_v62  ;;  %2400 = vmatprep.subr.mxu1 %v696_v37  ;;  %2374 = vmatpush3.msra.mxu0 %v3420_v56  ;;  %v4649_v31 = vand.u32 4294901760, %v3489_v59  ;;  %v3510_v5 = vand.u32 4294901760, %v3478_v38  ;;  %v3512_v62 = vld [vmem:[#allocation7 + $0x88] sm:$0xff]  ;;  %v4786_v37 = vand.u32 4294901760, %v3476_v3  ;;  %p2895_p6 = por %p2894_p3, %p2893_p2 }
  0x60   : > { %4784 = vst [vmem:[#allocation52_spill] sm:$0xff] %v3499_v23  ;;  %v703_v41 = vand.u32 4294901760, %v702_v17  ;;  %2401 = vmatpush3.msra.mxu1 %v584_v32  ;;  %2375 = vmatprep.subr.mxu0 %v3432_v61  ;;  %v3520_v17 = vsub.f32 %v3369_v55, %v3398_v11  ;;  %v3523_v50 = vand.u32 4294901760, %v3491_v33  ;;  %v3532_v0 = vsub.f32 %v3376_v60, %v3409_v46  ;;  %v3537_v55 = vld [vmem:[#allocation7 + $0x8] sm:$0xff]  ;;  %v3548_v60 = vld [vmem:[#allocation7 + $0x80] sm:$0xff] }
  0x61   : > { %4785 = vst [vmem:[#allocation53_spill] sm:$0xff] %v3510_v5  ;;  %v591_v47 = vand.u32 4294901760, %v590_v30  ;;  %v709_v54 = vsub.f32 %v3476_v3, %v4786_v37  ;;  %2376 = vmatpush3.msra.mxu0 %v3446_v25  ;;  %v597_v32 = vsub.f32 %v3489_v59, %v4649_v31  ;;  %v3535_v37 = vand.u32 4294901760, %v3501_v6  ;;  %p2896_p8 = pnand %p2895_p6, %p2891_p7 }
  0x62   : > { %2402 = vmatprep.subr.mxu1 %v703_v41  ;;  %4787 = vst [vmem:[#allocation54_spill] sm:$0xff] %v3532_v0  ;;  %2377 = vmatprep.subr.mxu0 %v3465_v48  ;;  %v3543_v31 = vsub.f32 %v3388_v2, %v3420_v56  ;;  %v3546_v30 = vand.u32 4294901760, %v3512_v62  ;;  %v4790_v45 = vand.u32 4294901760, %v3507_v43  ;;  %v3557_v11 = vsub.f32 %v3400_v12, %v3432_v61 }
  0x63   : > { %4788 = vst [vmem:[#allocation55_spill] sm:$0xff] %v3535_v37  ;;  %2403 = vmatpush3.msra.mxu1 %v591_v47  ;;  %v710_v41 = vand.u32 4294901760, %v709_v54  ;;  %2378 = vmatpush3.msra.mxu0 %v3485_v16  ;;  %v598_v46 = vand.u32 4294901760, %v597_v32  ;;  %v4792_v2 = vand.u32 4294901760, %v3520_v17  ;;  %v3565_v40 = vand.u32 4294901760, %v3537_v55  ;;  %v3571_v54 = vld [vmem:[#allocation7] sm:$0xff] }
  0x64   : > { %4789 = vst [vmem:[#allocation56_spill] sm:$0xff] %v3546_v30  ;;  %v716_v47 = vsub.f32 %v3507_v43, %v4790_v45  ;;  %4791 = vst [vmem:[#allocation57_spill] sm:$0xff] %v3557_v11  ;;  %2379 = vmatprep.subr.mxu0 %v3499_v23  ;;  %v3569_v45 = vsub.f32 %v3411_v18, %v3446_v25  ;;  %v3579_v32 = vand.u32 4294901760, %v3548_v60  ;;  %v4797_v34 = vand.u32 4294901760, %v3557_v11 }
  0x65   : > { %2404 = vmatprep.subr.mxu1 %v710_v41  ;;  %v604_v56 = vsub.f32 %v3520_v17, %v4792_v2  ;;  %4793 = vst [vmem:[#allocation58_spill] sm:$0xff] %v3565_v40  ;;  %2380 = vmatpush3.msra.mxu0 %v3510_v5  ;;  %v4794_v41 = vand.u32 4294901760, %v3532_v0 }
  0x66   : > { %2405 = vmatpush3.msra.mxu1 %v598_v46  ;;  %v717_v12 = vand.u32 4294901760, %v716_v47  ;;  %2381 = vmatprep.subr.mxu0 %v3523_v50  ;;  %v4796_v46 = vand.u32 4294901760, %v3543_v31 }
  0x67   : > { %v723_v61 = vsub.f32 %v3532_v0, %v4794_v41  ;;  %v605_v18 = vand.u32 4294901760, %v604_v56  ;;  %v3592_v41 = vsub.f32 %v3434_v24, %v3465_v48  ;;  %2382 = vmatpush3.msra.mxu0 %v3535_v37  ;;  %v730_v56 = vsub.f32 %v3557_v11, %v4797_v34 }
  0x68   : > { %v611_v47 = vsub.f32 %v3543_v31, %v4796_v46  ;;  %2406 = vmatprep.subr.mxu1 %v717_v12  ;;  %v3599_v0 = vand.u32 4294901760, %v3571_v54  ;;  %v3603_v46 = vsub.f32 %v3457_v53, %v3485_v16  ;;  %2383 = vmatprep.subr.mxu0 %v3546_v30  ;;  %v4798_v24 = vand.u32 4294901760, %v3569_v45 }
  0x69   : > { %v724_v2 = vand.u32 4294901760, %v723_v61  ;;  %2407 = vmatpush3.msra.mxu1 %v605_v18  ;;  %v4799_v48 = vsub.s32 1, %v3264_v1  ;;  %v731_v11 = vand.u32 4294901760, %v730_v56  ;;  %2384 = vmatpush3.msra.mxu0 %v3565_v40  ;;  %v3617_v18 = vsub.f32 %v3467_v57, %v3499_v23 }
  0x6a   : > { %v612_v25 = vand.u32 4294901760, %v611_v47  ;;  %v618_v61 = vsub.f32 %v3569_v45, %v4798_v24  ;;  %v4800_v47 = vsub.s32 0, %v3264_v1  ;;  %2385 = vmatprep.subr.mxu0 %v3579_v32  ;;  %v3630_v53 = vsub.f32 %v3478_v38, %v3510_v5 }
  0x6b   : > { %v419_v34 = vrot.slane %v3583_v36, %v4799_v48  ;;  %2408 = vmatprep.subr.mxu1 %v724_v2  ;;  %v4801_v48 = vand.u32 4294901760, %v3592_v41  ;;  %2386 = vmatpush3.msra.mxu0 %v3599_v0  ;;  %v4803_v57 = vand.u32 4294901760, %v3603_v46  ;;  %v4805_v1 = vand.u32 4294901760, %v3617_v18 }
  0x6c   : > { %v415_v24 = vrot.slane %v3583_v36, %v4800_v47  ;;  %2409 = vmatpush3.msra.mxu1 %v612_v25  ;;  %v619_v12 = vand.u32 4294901760, %v618_v61  ;;  %2425 = vmatprep.subr.mxu0 %v3288_v22 }
  0x6d   : > { %v737_v2 = vsub.f32 %v3592_v41, %v4801_v48  ;;  %v3626_v56 = vand.u32 4294901760, %v419_v34  ;;  %2410 = vmatprep.subr.mxu1 %v731_v11  ;;  %v625_v25 = vsub.f32 %v3603_v46, %v4803_v57  ;;  %v3641_v48 = vsub.f32 %v3491_v33, %v3523_v50 }
  0x6e   : > { %v3637_v47 = vand.u32 4294901760, %v415_v24  ;;  %2411 = vmatpush3.msra.mxu1 %v619_v12  ;;  %v4678_v11 = vand.u32 4294901760, %v3630_v53  ;;  %v3650_v57 = vsub.f32 %v3501_v6, %v3535_v37  ;;  %v744_v5 = vsub.f32 %v3617_v18, %v4805_v1 }
  0x6f   : > { %4802 = vst [vmem:[#allocation60_spill] sm:$0xff] %v3626_v56  ;;  %v738_v36 = vand.u32 4294901760, %v737_v2  ;;  %v3644_v38 = vsub.f32 %v419_v34, %v3626_v56  ;;  %v626_v61 = vand.u32 4294901760, %v625_v25  ;;  %v4681_v12 = vand.u32 4294901760, %v3641_v48  ;;  %769 = vmatprep.mubr.f32.mxu1 %v3626_v56 }
  0x70   : > { %4804 = vst [vmem:[#allocation61_spill] sm:$0xff] %v3637_v47  ;;  %v3656_v33 = vsub.f32 %v415_v24, %v3637_v47  ;;  %v632_v6 = vsub.f32 %v3630_v53, %v4678_v11  ;;  %v3667_v25 = vsub.f32 %v3512_v62, %v3546_v30  ;;  %v745_v1 = vand.u32 4294901760, %v744_v5 }
  0x71   : > { %2412 = vmatprep.subr.mxu1 %v738_v36  ;;  %v751_v36 = vsub.f32 %v3641_v48, %v4681_v12  ;;  %v3675_v34 = vsub.f32 %v3537_v55, %v3565_v40  ;;  %v4806_v11 = vand.u32 4294901760, %v3644_v38  ;;  %v4807_v62 = vand.u32 4294901760, %v3650_v57 }
  0x72   : > { %2413 = vmatpush3.msra.mxu1 %v626_v61  ;;  %v4692_v24 = vand.u32 4294901760, %v3656_v33  ;;  %v633_v56 = vand.u32 4294901760, %v632_v6  ;;  %v4691_v5 = vand.u32 4294901760, %v3667_v25  ;;  %v3690_v40 = vsub.f32 %v3548_v60, %v3579_v32 }
  0x73   : > { %v531_v2 = vsub.f32 %v3644_v38, %v4806_v11  ;;  %v639_v61 = vsub.f32 %v3650_v57, %v4807_v62  ;;  %2414 = vmatprep.subr.mxu1 %v745_v1  ;;  %v752_v30 = vand.u32 4294901760, %v751_v36  ;;  %v4690_v55 = vand.u32 4294901760, %v3675_v34 }
  0x74   : > { %v537_v12 = vsub.f32 %v3656_v33, %v4692_v24  ;;  %2415 = vmatpush3.msra.mxu1 %v633_v56  ;;  %v758_v62 = vsub.f32 %v3667_v25, %v4691_v5  ;;  %v3697_v1 = vsub.f32 %v3571_v54, %v3599_v0  ;;  %v4689_v60 = vand.u32 4294901760, %v3690_v40  ;;  %v4822_v5 = vld [vmem:[#allocation50_spill] sm:$0xff] }
  0x75   : > { %v532_v11 = vand.u32 4294901760, %v531_v2  ;;  %v640_v6 = vand.u32 4294901760, %v639_v61  ;;  %2416 = vmatprep.subr.mxu1 %v752_v30  ;;  %v646_v36 = vsub.f32 %v3675_v34, %v4690_v55  ;;  %v4821_v55 = vld [vmem:[#allocation49_spill] sm:$0xff]  ;;  %v4823_v24 = vand.u32 4294901760, %v3288_v22 }
  0x76   : > { %4808 = vst [vmem:[#allocation62_spill] sm:$0xff] %v3697_v1  ;;  %v538_v37 = vand.u32 4294901760, %v537_v12  ;;  %v759_v56 = vand.u32 4294901760, %v758_v62  ;;  %v4688_v2 = vand.u32 4294901760, %v3697_v1  ;;  %v765_v54 = vsub.f32 %v3690_v40, %v4689_v60  ;;  %v4811_v62 = vld [vmem:[#allocation40_spill] sm:$0xff] }
  0x77   : > { %533 = vmatprep.mubr.f32.mxu0 %v532_v11  ;;  %2417 = vmatpush3.msra.mxu1 %v640_v6  ;;  %v647_v61 = vand.u32 4294901760, %v646_v36  ;;  %v4810_v6 = vld [vmem:[#allocation39_spill] sm:$0xff]  ;;  %v4812_v36 = vld [vmem:[#allocation57_spill] sm:$0xff]  ;;  %v4820_v60 = vld [vmem:[#allocation48_spill] sm:$0xff]  ;;  %v4830_v22 = vand.u32 4294901760, %v3330_v39 }
  0x78   : > { %539 = vmatmul.mubr.f32.vlgmr.msra.gmra.mxu0 %v538_v37  ;;  %2418 = vmatprep.subr.mxu1 %v759_v56  ;;  %v653_v30 = vsub.f32 %v3697_v1, %v4688_v2  ;;  %v766_v12 = vand.u32 4294901760, %v765_v54  ;;  %v4809_v37 = vld [vmem:[#allocation54_spill] sm:$0xff]  ;;  %v4813_v56 = vld [vmem:[#allocation41_spill] sm:$0xff]  ;;  %v4815_v54 = vld [vmem:[#allocation43_spill] sm:$0xff] }
  0x79   : > { %2426 = vmatpush3.msra.mxu0 %v3301_v27  ;;  %2419 = vmatpush3.msra.mxu1 %v647_v61  ;;  %v4814_v61 = vld [vmem:[#allocation42_spill] sm:$0xff]  ;;  %v4819_v2 = vld [vmem:[#allocation47_spill] sm:$0xff] }
  0x7a   : > { %2427 = vmatprep.subr.mxu0 %v3307_v29  ;;  %v654_v11 = vand.u32 4294901760, %v653_v30  ;;  %906 = vmatprep.mubr.f32.mxu0 %v3644_v38  ;;  %v4816_v30 = vld [vmem:[#allocation44_spill] sm:$0xff] }
  0x7b   : > { %2428 = vmatpush3.msra.mxu0 %v3321_v35  ;;  %2420 = vmatprep.subr.mxu1 %v766_v12  ;;  %v4817_v12 = vld [vmem:[#allocation45_spill] sm:$0xff] }
  0x7c   : > { %2429 = vmatprep.subr.mxu0 %v3330_v39  ;;  %2421 = vmatpush3.msra.mxu1 %v654_v11  ;;  %v4818_v11 = vld [vmem:[#allocation46_spill] sm:$0xff]  ;;  %v4836_v39 = vand.u32 4294901760, %v3656_v33 }
  0x7d   : > { %2430 = vmatpush3.msra.mxu0 %v3343_v44  ;;  %771 = vmatmul.mubr.f32.vlgmr.msra.gmra.mxu1 %v3637_v47  ;;  %v4824_v47 = vld [vmem:[#allocation53_spill] sm:$0xff] }
  0x7e   : > { %2431 = vmatprep.subr.mxu0 %v3357_v49  ;;  %2460 = vmatprep.subr.mxu1 %v3268_v7 }
  0x7f   : > { %2432 = vmatpush3.msra.mxu0 %v3383_v63  ;;  %2461 = vmatpush3.msra.mxu1 %v3270_v8 }
  0x80   : > { %2433 = vmatprep.subr.mxu0 %v3395_v10  ;;  %2462 = vmatprep.subr.mxu1 %v3272_v9 }
  0x81   : > { %2434 = vmatpush3.msra.mxu0 %v3406_v42  ;;  %2463 = vmatpush3.msra.mxu1 %v3274_v13 }
  0x82   : > { %2435 = vmatprep.subr.mxu0 %v3417_v52  ;;  %2464 = vmatprep.subr.mxu1 %v3276_v14 }
  0x83   : > { %2436 = vmatpush3.msra.mxu0 %v3429_v58  ;;  %2465 = vmatpush3.msra.mxu1 %v3278_v15 }
  0x84   : > { %2437 = vmatprep.subr.mxu0 %v3443_v4  ;;  %2466 = vmatprep.subr.mxu1 %v3281_v19 }
  0x85   : > { %2438 = vmatpush3.msra.mxu0 %v3455_v51  ;;  %2467 = vmatpush3.msra.mxu1 %v3283_v20 }
  0x86   : > { %2439 = vmatprep.subr.mxu0 %v3476_v3  ;;  %2468 = vmatprep.subr.mxu1 %v3285_v21 }
  0x87   : > { %2440 = vmatpush3.msra.mxu0 %v3489_v59  ;;  %2469 = vmatpush3.msra.mxu1 %v3298_v26 }
  0x88   : > { %2441 = vmatprep.subr.mxu0 %v3507_v43  ;;  %2470 = vmatprep.subr.mxu1 %v3304_v28 }
  0x89   : > { %2442 = vmatpush3.msra.mxu0 %v3520_v17  ;;  %2471 = vmatpush3.msra.mxu1 %v4810_v6 }
  0x8a   : > { %2443 = vmatprep.subr.mxu0 %v4809_v37  ;;  %2472 = vmatprep.subr.mxu1 %v4811_v62 }
  0x8b   : > { %2444 = vmatpush3.msra.mxu0 %v3543_v31  ;;  %2473 = vmatpush3.msra.mxu1 %v4813_v56 }
  0x8c   : > { %2445 = vmatprep.subr.mxu0 %v4812_v36  ;;  %2474 = vmatprep.subr.mxu1 %v4814_v61 }
  0x8d   : > { %2446 = vmatpush3.msra.mxu0 %v3569_v45  ;;  %2475 = vmatpush3.msra.mxu1 %v4815_v54 }
  0x8e   : > { %2447 = vmatprep.subr.mxu0 %v3592_v41  ;;  %2476 = vmatprep.subr.mxu1 %v4816_v30 }
  0x8f   : > { %2448 = vmatpush3.msra.mxu0 %v3603_v46  ;;  %2477 = vmatpush3.msra.mxu1 %v4817_v12 }
  0x90   : > { %2449 = vmatprep.subr.mxu0 %v3617_v18  ;;  %2478 = vmatprep.subr.mxu1 %v4818_v11 }
  0x91   : > { %2450 = vmatpush3.msra.mxu0 %v3630_v53  ;;  %2479 = vmatpush3.msra.mxu1 %v4819_v2 }
  0x92   : > { %2451 = vmatprep.subr.mxu0 %v3641_v48  ;;  %2480 = vmatprep.subr.mxu1 %v4820_v60 }
  0x93   : > { %2452 = vmatpush3.msra.mxu0 %v3650_v57  ;;  %2481 = vmatpush3.msra.mxu1 %v4821_v55  ;;  %v4825_v55 = vand.u32 4294901760, %v3301_v27  ;;  %v4832_v27 = vand.u32 4294901760, %v3343_v44  ;;  %v4838_v44 = vand.u32 4294901760, %v3406_v42  ;;  %v4842_v42 = vand.u32 4294901760, %v3455_v51 }
  0x94   : > { %2453 = vmatprep.subr.mxu0 %v3667_v25  ;;  %2482 = vmatprep.subr.mxu1 %v4822_v5  ;;  %v4826_v5 = vand.u32 4294901760, %v3307_v29  ;;  %v4833_v29 = vand.u32 4294901760, %v3357_v49  ;;  %v4839_v49 = vand.u32 4294901760, %v3417_v52  ;;  %v392_v52 = vld [vmem:[#allocation7 + $0x170] sm:$0xff]  ;;  %v4845_v51 = vand.u32 4294901760, %v3507_v43 }
  0x95   : > { %2454 = vmatpush3.msra.mxu0 %v3675_v34  ;;  %2483 = vmatpush3.msra.mxu1 %v3485_v16  ;;  %v4827_v16 = vld [vmem:[#allocation55_spill] sm:$0xff] }
  0x96   : > { %2455 = vmatprep.subr.mxu0 %v3690_v40  ;;  %2484 = vmatprep.subr.mxu1 %v3499_v23  ;;  %v4829_v23 = vld [vmem:[#allocation56_spill] sm:$0xff] }
  0x97   : > { %2456 = vmatpush3.msra.mxu0 %v3697_v1  ;;  %2485 = vmatpush3.msra.mxu1 %v4824_v47  ;;  %v4828_v1 = vand.u32 4294901760, %v3321_v35  ;;  %v4834_v35 = vand.u32 4294901760, %v3644_v38 }
  0x98   : > { %909 = vmatmul.mubr.f32.vlgmr.msra.gmra.mxu0 %v3656_v33  ;;  %2495 = vmatprep.subr.mxu0 %v4823_v24  ;;  %v4831_v24 = vld [vmem:[#allocation58_spill] sm:$0xff] }
  0x99   : > { %2496 = vmatpush3.msra.mxu0 %v4825_v55  ;;  %2486 = vmatprep.subr.mxu1 %v3523_v50  ;;  %v4837_v55 = vand.u32 4294901760, %v3395_v10  ;;  %v4841_v10 = vand.u32 4294901760, %v3443_v4  ;;  %v3827_v4 = vand.u32 4294901760, %v392_v52  ;;  %v390_v33 = vld [vmem:[#allocation7 + $0x160] sm:$0xff] }
  0x9a   : > { %2497 = vmatprep.subr.mxu0 %v4826_v5  ;;  %2487 = vmatpush3.msra.mxu1 %v4827_v16  ;;  %v4835_v5 = vand.u32 4294901760, %v3383_v63  ;;  %v4840_v63 = vand.u32 4294901760, %v3429_v58 }
  0x9b   : > { %2498 = vmatpush3.msra.mxu0 %v4828_v1  ;;  %2488 = vmatprep.subr.mxu1 %v4829_v23  ;;  %4846 = vst [vmem:[#allocation54_spill] sm:$0xff] %v3827_v4 }
  0x9c   : > { %2499 = vmatprep.subr.mxu0 %v4830_v22  ;;  %2489 = vmatpush3.msra.mxu1 %v4831_v24  ;;  %v4854_v22 = vand.u32 4294901760, %v3569_v45 }
  0x9d   : > { %2500 = vmatpush3.msra.mxu0 %v4832_v27  ;;  %2490 = vmatprep.subr.mxu1 %v3579_v32  ;;  %v389_v27 = vld [vmem:[#allocation7 + $0x158] sm:$0xff] }
  0x9e   : > { %2501 = vmatprep.subr.mxu0 %v4833_v29  ;;  %2491 = vmatpush3.msra.mxu1 %v3599_v0 }
  0x9f   : > { %1013 = vmatprep.mubr.f32.mxu1 %v4834_v35  ;;  %2502 = vmatpush3.msra.mxu0 %v4835_v5  ;;  %v4857_v35 = vand.u32 4294901760, %v3603_v46 }
  0xa0   : > { %1017 = vmatmul.mubr.f32.vlgmr.msra.gmra.mxu1 %v4836_v39  ;;  %2503 = vmatprep.subr.mxu0 %v4837_v55  ;;  %v4860_v39 = vand.u32 4294901760, %v3617_v18  ;;  %v4863_v18 = vand.u32 4294901760, %v3641_v48 }
  0xa1   : > { %2530 = vmatprep.subr.mxu1 %v3268_v7  ;;  %2504 = vmatpush3.msra.mxu0 %v4838_v44  ;;  %v393_v7 = vld [vmem:[#allocation7 + $0x178] sm:$0xff]  ;;  %v4861_v44 = vand.u32 4294901760, %v3630_v53  ;;  %v4865_v53 = vand.u32 4294901760, %v3650_v57 }
  0xa2   : > { %2531 = vmatpush3.msra.mxu1 %v3270_v8  ;;  %2505 = vmatprep.subr.mxu0 %v4839_v49  ;;  %v409_v8 = vld [vmem:[#allocation7 + $0x1f8] sm:$0xff]  ;;  %v3820_v58 = vand.u32 4294901760, %v393_v7  ;;  %v3889_v49 = vand.u32 4294901760, %v389_v27 }
  0xa3   : > { %2532 = vmatprep.subr.mxu1 %v3272_v9  ;;  %2506 = vmatpush3.msra.mxu0 %v4840_v63  ;;  %v4843_v9 = vand.u32 4294901760, %v3476_v3  ;;  %v407_v3 = vld [vmem:[#allocation7 + $0x1e8] sm:$0xff]  ;;  %v404_v63 = vld [vmem:[#allocation7 + $0x1d0] sm:$0xff] }
  0xa4   : > { %2533 = vmatpush3.msra.mxu1 %v3274_v13  ;;  %2507 = vmatprep.subr.mxu0 %v4841_v10  ;;  %v4844_v13 = vand.u32 4294901760, %v3489_v59  ;;  %v391_v59 = vld [vmem:[#allocation7 + $0x168] sm:$0xff]  ;;  %v3841_v38 = vsub.f32 %v393_v7, %v3820_v58  ;;  %4862 = vst [vmem:[#allocation44_spill] sm:$0xff] %v3889_v49 }
  0xa5   : > { %2534 = vmatprep.subr.mxu1 %v3276_v14  ;;  %2508 = vmatpush3.msra.mxu0 %v4842_v42  ;;  %v408_v14 = vld [vmem:[#allocation7 + $0x1f0] sm:$0xff]  ;;  %v3851_v1 = vand.u32 4294901760, %v391_v59  ;;  %v387_v42 = vld [vmem:[#allocation7 + $0x148] sm:$0xff] }
  0xa6   : > { %2535 = vmatpush3.msra.mxu1 %v3278_v15  ;;  %2509 = vmatprep.subr.mxu0 %v4843_v9  ;;  %v3825_v15 = vand.u32 4294901760, %v409_v8  ;;  %v3835_v43 = vand.u32 4294901760, %v408_v14  ;;  %v4866_v9 = vand.u32 4294901760, %v3667_v25  ;;  %v4869_v25 = vld [vmem:[#allocation49_spill] sm:$0xff] }
  0xa7   : > { %2536 = vmatprep.subr.mxu1 %v3281_v19  ;;  %2510 = vmatpush3.msra.mxu0 %v4844_v13  ;;  %v4847_v19 = vand.u32 4294901760, %v3520_v17  ;;  %v3843_v17 = vand.u32 4294901760, %v407_v3  ;;  %4853 = vst [vmem:[#allocation57_spill] sm:$0xff] %v3851_v1  ;;  %v3882_v46 = vsub.f32 %v391_v59, %v3851_v1 }
  0xa8   : > { %2537 = vmatpush3.msra.mxu1 %v3283_v20  ;;  %2511 = vmatprep.subr.mxu0 %v4845_v51  ;;  %v4848_v20 = vand.u32 4294901760, %v4809_v37  ;;  %4849 = vst [vmem:[#allocation39_spill] sm:$0xff] %v3835_v43  ;;  %v405_v37 = vld [vmem:[#allocation7 + $0x1d8] sm:$0xff]  ;;  %v3865_v29 = vsub.f32 %v408_v14, %v3835_v43  ;;  %v4868_v51 = vand.u32 4294901760, %v3675_v34 }
  0xa9   : > { %2538 = vmatprep.subr.mxu1 %v3285_v21  ;;  %2512 = vmatpush3.msra.mxu0 %v4847_v19  ;;  %v4850_v21 = vand.u32 4294901760, %v3543_v31  ;;  %4851 = vst [vmem:[#allocation40_spill] sm:$0xff] %v3843_v17  ;;  %v406_v31 = vld [vmem:[#allocation7 + $0x1e0] sm:$0xff]  ;;  %v3872_v5 = vand.u32 4294901760, %v405_v37  ;;  %v4702_v14 = vand.u32 4294901760, %v3882_v46 }
  0xaa   : > { %2539 = vmatpush3.msra.mxu1 %v3298_v26  ;;  %2513 = vmatprep.subr.mxu0 %v4848_v20  ;;  %v4852_v26 = vand.u32 4294901760, %v4812_v36  ;;  %v4855_v36 = vand.u32 4294901760, %v3592_v41  ;;  %v3870_v45 = vand.u32 4294901760, %v406_v31  ;;  %v4701_v41 = vand.u32 4294901760, %v3841_v38  ;;  %v4871_v19 = vld [vmem:[#allocation38_spill] sm:$0xff] }
  0xab   : > { %2540 = vmatprep.subr.mxu1 %v3304_v28  ;;  %2514 = vmatpush3.msra.mxu0 %v4850_v21  ;;  %v3849_v28 = vsub.f32 %v392_v52, %v3827_v4  ;;  %4859 = vst [vmem:[#allocation43_spill] sm:$0xff] %v3872_v5  ;;  %v4700_v10 = vand.u32 4294901760, %v3865_v29  ;;  %v3913_v52 = vsub.f32 %v405_v37, %v3872_v5  ;;  %v4872_v20 = vand.u32 4294901760, %v3690_v40  ;;  %v4873_v21 = vld [vmem:[#allocation50_spill] sm:$0xff] }
  0xac   : > { %2541 = vmatpush3.msra.mxu1 %v4810_v6  ;;  %2515 = vmatprep.subr.mxu0 %v4852_v26  ;;  %v3854_v6 = vsub.f32 %v409_v8, %v3825_v15  ;;  %4858 = vst [vmem:[#allocation42_spill] sm:$0xff] %v3870_v45  ;;  %v3906_v48 = vsub.f32 %v3841_v38, %v4701_v41  ;;  %v386_v37 = vld [vmem:[#allocation7 + $0x140] sm:$0xff]  ;;  %v384_v41 = vld [vmem:[#allocation7 + $0x130] sm:$0xff] }
  0xad   : > { %2542 = vmatprep.subr.mxu1 %v4811_v62  ;;  %2516 = vmatpush3.msra.mxu0 %v4854_v22  ;;  %v3862_v62 = vand.u32 4294901760, %v390_v33  ;;  %v4699_v55 = vand.u32 4294901760, %v3849_v28  ;;  %v3910_v8 = vsub.f32 %v406_v31, %v3870_v45  ;;  %v402_v31 = vld [vmem:[#allocation7 + $0x1c0] sm:$0xff] }
  0xae   : > { %2543 = vmatpush3.msra.mxu1 %v4813_v56  ;;  %2517 = vmatprep.subr.mxu0 %v4855_v36  ;;  %v388_v56 = vld [vmem:[#allocation7 + $0x150] sm:$0xff]  ;;  %v385_v36 = vld [vmem:[#allocation7 + $0x138] sm:$0xff] }
  0xaf   : > { %2544 = vmatprep.subr.mxu1 %v4814_v61  ;;  %4856 = vst [vmem:[#allocation41_spill] sm:$0xff] %v3862_v62  ;;  %2518 = vmatpush3.msra.mxu0 %v4857_v35  ;;  %v3876_v61 = vsub.f32 %v407_v3, %v3843_v17  ;;  %v3898_v7 = vand.u32 4294901760, %v388_v56  ;;  %v3928_v13 = vsub.f32 %v3849_v28, %v4699_v55  ;;  %v3937_v3 = vand.u32 4294901760, %v387_v42  ;;  %v4878_v35 = vld [vmem:[#allocation60_spill] sm:$0xff] }
  0xb0   : > { %2545 = vmatpush3.msra.mxu1 %v4815_v54  ;;  %2519 = vmatprep.subr.mxu0 %v4860_v39  ;;  %v4703_v54 = vand.u32 4294901760, %v3854_v6  ;;  %v3986_v55 = vand.u32 4294901760, %v386_v37  ;;  %v4024_v39 = vand.u32 4294901760, %v384_v41 }
  0xb1   : > { %2546 = vmatprep.subr.mxu1 %v4816_v30  ;;  %2520 = vmatpush3.msra.mxu0 %v4861_v44  ;;  %v3895_v30 = vsub.f32 %v390_v33, %v3862_v62  ;;  %4864 = vst [vmem:[#allocation45_spill] sm:$0xff] %v3898_v7  ;;  %4870 = vst [vmem:[#allocation47_spill] sm:$0xff] %v3937_v3  ;;  %v3946_v33 = vsub.f32 %v3865_v29, %v4700_v10  ;;  %v3988_v10 = vand.u32 4294901760, %v385_v36 }
  0xb2   : > { %2547 = vmatpush3.msra.mxu1 %v4817_v12  ;;  %2521 = vmatprep.subr.mxu0 %v4863_v18  ;;  %v403_v12 = vld [vmem:[#allocation7 + $0x1c8] sm:$0xff]  ;;  %v3921_v57 = vsub.f32 %v3854_v6, %v4703_v54  ;;  %v3949_v34 = vsub.f32 %v388_v56, %v3898_v7  ;;  %v4705_v56 = vand.u32 4294901760, %v3910_v8  ;;  %v3964_v18 = vld [vmem:[#allocation7 + $0x1b8] sm:$0xff]  ;;  %4883 = vst [vmem:[#allocation56_spill] sm:$0xff] %v3986_v55  ;;  %v4002_v54 = vld [vmem:[#allocation7 + $0x1b0] sm:$0xff] }
  0xb3   : > { %2548 = vmatprep.subr.mxu1 %v4818_v11  ;;  %2522 = vmatpush3.msra.mxu0 %v4865_v53  ;;  %v4698_v11 = vand.u32 4294901760, %v3876_v61  ;;  %v3951_v26 = vand.u32 4294901760, %v403_v12  ;;  %v4704_v22 = vand.u32 4294901760, %v3895_v30  ;;  %v4706_v53 = vand.u32 4294901760, %v3913_v52  ;;  %4884 = vst [vmem:[#allocation58_spill] sm:$0xff] %v3988_v10  ;;  %4886 = vst [vmem:[#allocation38_spill] sm:$0xff] %v4024_v39 }
  0xb4   : > { %2549 = vmatpush3.msra.mxu1 %v4819_v2  ;;  %2523 = vmatprep.subr.mxu0 %v4866_v9  ;;  %v3923_v2 = vand.u32 4294901760, %v404_v63  ;;  %4874 = vst [vmem:[#allocation48_spill] sm:$0xff] %v3949_v34  ;;  %v4879_v9 = vld [vmem:[#allocation51_spill] sm:$0xff] }
  0xb5   : > { %2550 = vmatprep.subr.mxu1 %v4820_v60  ;;  %2524 = vmatpush3.msra.mxu0 %v4868_v51  ;;  %v3935_v60 = vsub.f32 %v389_v27, %v3889_v49  ;;  %4875 = vst [vmem:[#allocation53_spill] sm:$0xff] %v3951_v26  ;;  %v4876_v27 = vld [vmem:[#allocation62_spill] sm:$0xff]  ;;  %v3961_v44 = vsub.f32 %v3876_v61, %v4698_v11  ;;  %v4880_v51 = vld [vmem:[#allocation61_spill] sm:$0xff]  ;;  %v3984_v11 = vand.u32 4294901760, %v402_v31 }
  0xb6   : > { %4867 = vst [vmem:[#allocation46_spill] sm:$0xff] %v3923_v2  ;;  %2551 = vmatpush3.msra.mxu1 %v4869_v25  ;;  %2525 = vmatprep.subr.mxu0 %v4872_v20  ;;  %v4877_v40 = vand.u32 4294901760, %v4876_v27  ;;  %v3977_v27 = vsub.f32 %v404_v63, %v3923_v2  ;;  %v4010_v20 = vsub.f32 %v3910_v8, %v4705_v56  ;;  %v4027_v25 = vld [vmem:[#allocation7 + $0x1a8] sm:$0xff]  ;;  %v382_v56 = vld [vmem:[#allocation7 + $0x120] sm:$0xff] }
  0xb7   : > { %2552 = vmatprep.subr.mxu1 %v4873_v21  ;;  %1183 = vmatprep.mubr.f32.mxu0 %v4878_v35  ;;  %v3974_v21 = vsub.f32 %v3882_v46, %v4702_v14  ;;  %4882 = vst [vmem:[#allocation55_spill] sm:$0xff] %v3984_v11  ;;  %v4709_v14 = vand.u32 4294901760, %v3935_v60  ;;  %v4018_v63 = vsub.f32 %v403_v12, %v3951_v26 }
  0xb8   : > { %2526 = vmatpush3.msra.mxu0 %v4877_v40  ;;  %2553 = vmatpush3.msra.mxu1 %v4879_v9  ;;  %v4881_v40 = vld [vmem:[#allocation52_spill] sm:$0xff]  ;;  %v3982_v9 = vsub.f32 %v387_v42, %v3937_v3  ;;  %v3999_v42 = vand.u32 4294901760, %v3964_v18  ;;  %v4032_v12 = vsub.f32 %v386_v37, %v3986_v55  ;;  %v4041_v59 = vsub.f32 %v402_v31, %v3984_v11 }
  0xb9   : > { %1185 = vmatmul.mubr.f32.vlgmr.msra.gmra.mxu0 %v4880_v51  ;;  %2554 = vmatprep.subr.mxu1 %v4881_v40  ;;  %v3996_v40 = vsub.f32 %v3895_v30, %v4704_v22  ;;  %v4015_v22 = vsub.f32 %v3913_v52, %v4706_v53  ;;  %v4038_v53 = vand.u32 4294901760, %v4002_v54  ;;  %v4049_v37 = vsub.f32 %v3935_v60, %v4709_v14 }
  0xba   : > { %2565 = vmatprep.subr.mxu0 %v3825_v15  ;;  %2555 = vmatpush3.msra.mxu1 %v4824_v47  ;;  %4885 = vst [vmem:[#allocation49_spill] sm:$0xff] %v3999_v42  ;;  %v422_v47 = vsub.s32 2, %v4871_v19  ;;  %v4890_v14 = vand.u32 4294901760, %v3977_v27 }
  0xbb   : > { %2566 = vmatpush3.msra.mxu0 %v3820_v58  ;;  %2556 = vmatprep.subr.mxu1 %v3523_v50  ;;  %4888 = vst [vmem:[#allocation62_spill] sm:$0xff] %v4038_v53  ;;  %v383_v50 = vld [vmem:[#allocation7 + $0x128] sm:$0xff] }
  0xbc   : > { %2567 = vmatprep.subr.mxu0 %v3835_v43  ;;  %2557 = vmatpush3.msra.mxu1 %v4827_v16  ;;  %v4035_v16 = vsub.f32 %v385_v36, %v3988_v10  ;;  %v4066_v36 = vsub.f32 %v3977_v27, %v4890_v14  ;;  %v4081_v14 = vand.u32 4294901760, %v382_v56 }
  0xbd   : > { %2568 = vmatpush3.msra.mxu0 %v3827_v4  ;;  %2558 = vmatprep.subr.mxu1 %v4829_v23  ;;  %v4058_v23 = vand.u32 4294901760, %v4027_v25  ;;  %v4895_v4 = vld [vmem:[#allocation59_spill] sm:$0xff] }
  0xbe   : > { %2569 = vmatprep.subr.mxu0 %v3843_v17  ;;  %4887 = vst [vmem:[#allocation50_spill] sm:$0xff] %v4035_v16  ;;  %2559 = vmatpush3.msra.mxu1 %v4831_v24  ;;  %v1544_v24 = vand.u32 4294901760, %v4010_v20  ;;  %v4891_v20 = vand.u32 4294901760, %v3949_v34  ;;  %v381_v17 = vld [vmem:[#allocation7 + $0x118] sm:$0xff]  ;;  %4893 = vst [vmem:[#allocation61_spill] sm:$0xff] %v4081_v14 }
  0xbf   : > { %2570 = vmatpush3.msra.mxu0 %v3851_v1  ;;  %2560 = vmatprep.subr.mxu1 %v3579_v32  ;;  %4889 = vst [vmem:[#allocation60_spill] sm:$0xff] %v4058_v23  ;;  %v4069_v32 = vsub.f32 %v384_v41, %v4024_v39  ;;  %v398_v1 = vld [vmem:[#allocation7 + $0x1a0] sm:$0xff]  ;;  %v4901_v41 = vand.u32 4294901760, %v3928_v13  ;;  %v4905_v13 = vand.u32 4294901760, %v3961_v44 }
  0xc0   : > { %2571 = vmatprep.subr.mxu0 %v3870_v45  ;;  %2561 = vmatpush3.msra.mxu1 %v3599_v0  ;;  %v4074_v31 = vsub.f32 %v3949_v34, %v4891_v20  ;;  %v4076_v45 = vand.u32 4294901760, %v383_v50  ;;  %v4896_v20 = vand.u32 4294901760, %v3921_v57  ;;  %v1439_v34 = vand.u32 4294901760, %v4049_v37 }
  0xc1   : > { %1287 = vmatprep.mubr.f32.mxu1 %v4878_v35  ;;  %2572 = vmatpush3.msra.mxu0 %v3862_v62  ;;  %v4894_v35 = vsub.s32 3, %v4871_v19  ;;  %v4897_v62 = vand.u32 4294901760, %v3982_v9  ;;  %v4098_v0 = vsub.f32 %v3964_v18, %v3999_v42  ;;  %v423_v19 = vrot.slane %v4895_v4, %v422_v47 }
  0xc2   : > { %4892 = vst [vmem:[#allocation51_spill] sm:$0xff] %v4076_v45  ;;  %1289 = vmatmul.mubr.f32.vlgmr.msra.gmra.mxu1 %v4880_v51  ;;  %2573 = vmatprep.subr.mxu0 %v3872_v5  ;;  %v4899_v57 = vand.u32 4294901760, %v4018_v63  ;;  %v1558_v18 = vand.u32 4294901760, %v4066_v36  ;;  %v4120_v47 = vsub.f32 %v383_v50, %v4076_v45  ;;  %v4135_v36 = vsub.f32 %v382_v56, %v4081_v14 }
  0xc3   : > { %v427_v43 = vrot.slane %v4895_v4, %v4894_v35  ;;  %2600 = vmatprep.subr.mxu1 %v4896_v20  ;;  %v4094_v51 = vsub.f32 %v3982_v9, %v4897_v62  ;;  %2574 = vmatpush3.msra.mxu0 %v3889_v49  ;;  %v4898_v35 = vand.u32 4294901760, %v3906_v48  ;;  %v4109_v20 = vand.u32 4294901760, %v398_v1 }
  0xc4   : > { %v4107_v37 = vsub.f32 %v4018_v63, %v4899_v57  ;;  %v4111_v62 = vand.u32 4294901760, %v381_v17  ;;  %2575 = vmatprep.subr.mxu0 %v3923_v2  ;;  %v4900_v4 = vand.u32 4294901760, %v3946_v33  ;;  %v1446_v48 = vand.u32 4294901760, %v4074_v31 }
  0xc5   : > { %2601 = vmatpush3.msra.mxu1 %v4898_v35  ;;  %v397_v35 = vld [vmem:[#allocation7 + $0x198] sm:$0xff]  ;;  %v4124_v57 = vsub.f32 %v4002_v54, %v4038_v53  ;;  %2576 = vmatpush3.msra.mxu0 %v3898_v7  ;;  %v4902_v33 = vand.u32 4294901760, %v4041_v59  ;;  %v4903_v50 = vand.u32 4294901760, %v4032_v12  ;;  %v380_v54 = vld [vmem:[#allocation7 + $0x110] sm:$0xff]  ;;  %v4142_v2 = vand.u32 4294901760, %v427_v43 }
  0xc6   : > { %2602 = vmatprep.subr.mxu1 %v4900_v4  ;;  %2577 = vmatprep.subr.mxu0 %v3951_v26  ;;  %v396_v7 = vld [vmem:[#allocation7 + $0x190] sm:$0xff]  ;;  %v4151_v56 = vsub.f32 %v4027_v25, %v4058_v23  ;;  %v4153_v49 = vand.u32 4294901760, %v423_v19  ;;  %v1565_v26 = vand.u32 4294901760, %v4107_v37  ;;  %v4159_v44 = vand.u32 4294901760, %v397_v35  ;;  %v395_v25 = vld [vmem:[#allocation7 + $0x188] sm:$0xff] }
  0xc7   : > { %2603 = vmatpush3.msra.mxu1 %v4901_v41  ;;  %v4132_v4 = vsub.f32 %v4041_v59, %v4902_v33  ;;  %v4140_v31 = vsub.f32 %v4032_v12, %v4903_v50  ;;  %4904 = vst [vmem:[#allocation52_spill] sm:$0xff] %v4142_v2  ;;  %v1453_v41 = vand.u32 4294901760, %v4094_v51  ;;  %2578 = vmatpush3.msra.mxu0 %v3937_v3  ;;  %v4907_v50 = vand.u32 4294901760, %v3974_v21 }
  0xc8   : > { %2604 = vmatprep.subr.mxu1 %v4905_v13  ;;  %4906 = vst [vmem:[#allocation59_spill] sm:$0xff] %v4153_v49  ;;  %v4162_v51 = vsub.f32 %v381_v17, %v4111_v62  ;;  %v4908_v13 = vand.u32 4294901760, %v4035_v16  ;;  %2579 = vmatprep.subr.mxu0 %v3984_v11  ;;  %v4171_v21 = vand.u32 4294901760, %v380_v54  ;;  %v4175_v5 = vsub.f32 %v398_v1, %v4109_v20 }
  0xc9   : > { %2605 = vmatpush3.msra.mxu1 %v4907_v50  ;;  %v379_v50 = vld [vmem:[#allocation7 + $0x108] sm:$0xff]  ;;  %2580 = vmatpush3.msra.mxu0 %v3986_v55  ;;  %v4909_v17 = vand.u32 4294901760, %v3996_v40  ;;  %v1460_v11 = vand.u32 4294901760, %v4140_v31  ;;  %v4185_v3 = vsub.f32 %v427_v43, %v4142_v2  ;;  %v4911_v37 = vand.u32 4294901760, %v4015_v22  ;;  %v378_v31 = vld [vmem:[#allocation7 + $0x100] sm:$0xff] }
  0xca   : > { %v4167_v33 = vsub.f32 %v4035_v16, %v4908_v13  ;;  %2606 = vmatprep.subr.mxu1 %v1544_v24  ;;  %v1572_v13 = vand.u32 4294901760, %v4132_v4  ;;  %v4182_v24 = vand.u32 4294901760, %v396_v7  ;;  %2581 = vmatprep.subr.mxu0 %v3999_v42  ;;  %v4912_v1 = vand.u32 4294901760, %v4098_v0 }
  0xcb   : > { %2607 = vmatpush3.msra.mxu1 %v4909_v17  ;;  %v4193_v40 = vand.u32 4294901760, %v395_v25  ;;  %v394_v17 = vld [vmem:[#allocation7 + $0x180] sm:$0xff]  ;;  %v4197_v16 = vsub.f32 %v423_v19, %v4153_v49  ;;  %2582 = vmatpush3.msra.mxu0 %v3988_v10  ;;  %v4201_v22 = vand.u32 4294901760, %v379_v50  ;;  %v4913_v4 = vand.u32 4294901760, %v4124_v57 }
  0xcc   : > { %4910 = vst [vmem:[#allocation63_spill] sm:$0xff] %v4182_v24  ;;  %2608 = vmatprep.subr.mxu1 %v4911_v37  ;;  %v1578_v55 = vsub.f32 %v4098_v0, %v4912_v1  ;;  %v1467_v43 = vand.u32 4294901760, %v4167_v33  ;;  %v4205_v1 = vsub.f32 %v397_v35, %v4159_v44  ;;  %2583 = vmatprep.subr.mxu0 %v4038_v53  ;;  %v4219_v35 = vand.u32 4294901760, %v394_v17 }
  0xcd   : > { %2609 = vmatpush3.msra.mxu1 %v1439_v34  ;;  %v1585_v19 = vsub.f32 %v4124_v57, %v4913_v4  ;;  %v4212_v42 = vsub.f32 %v380_v54, %v4171_v21  ;;  %v4914_v34 = vand.u32 4294901760, %v4069_v32  ;;  %2584 = vmatpush3.msra.mxu0 %v4024_v39  ;;  %v4221_v37 = vand.u32 4294901760, %v378_v31 }
  0xce   : > { %2610 = vmatprep.subr.mxu1 %v1558_v18  ;;  %v4225_v4 = vsub.f32 %v396_v7, %v4182_v24  ;;  %2585 = vmatprep.subr.mxu0 %v4058_v23  ;;  %v1579_v54 = vand.u32 4294901760, %v1578_v55  ;;  %v4235_v18 = vsub.f32 %v379_v50, %v4201_v22  ;;  %v4916_v7 = vand.u32 4294901760, %v4120_v47 }
  0xcf   : > { %v1473_v33 = vsub.f32 %v4069_v32, %v4914_v34  ;;  %2611 = vmatpush3.msra.mxu1 %v1446_v48  ;;  %v4915_v34 = vand.u32 4294901760, %v4151_v56  ;;  %2586 = vmatpush3.msra.mxu0 %v4076_v45  ;;  %v4917_v39 = vand.u32 4294901760, %v4175_v5 }
  0xd0   : > { %2612 = vmatprep.subr.mxu1 %v1565_v26  ;;  %v1480_v23 = vsub.f32 %v4120_v47, %v4916_v7  ;;  %v4242_v26 = vsub.f32 %v395_v25, %v4193_v40  ;;  %2587 = vmatprep.subr.mxu0 %v4109_v20  ;;  %v4251_v7 = vsub.f32 %v378_v31, %v4221_v37  ;;  %v4919_v25 = vand.u32 4294901760, %v4185_v3 }
  0xd1   : > { %v1592_v10 = vsub.f32 %v4151_v56, %v4915_v34  ;;  %2613 = vmatpush3.msra.mxu1 %v1453_v41  ;;  %v1586_v34 = vand.u32 4294901760, %v1585_v19  ;;  %v1474_v48 = vand.u32 4294901760, %v1473_v33  ;;  %v1599_v41 = vsub.f32 %v4175_v5, %v4917_v39  ;;  %2588 = vmatpush3.msra.mxu0 %v4081_v14 }
  0xd2   : > { %2614 = vmatprep.subr.mxu1 %v1572_v13  ;;  %4918 = vst [vmem:[#allocation64_spill] sm:$0xff] %v4251_v7  ;;  %v1393_v55 = vsub.f32 %v4185_v3, %v4919_v25  ;;  %v4258_v19 = vsub.f32 %v394_v17, %v4219_v35  ;;  %2589 = vmatprep.subr.mxu0 %v4159_v44  ;;  %v4921_v33 = vand.u32 4294901760, %v4135_v36  ;;  %v4922_v31 = vand.u32 4294901760, %v4197_v16 }
  0xd3   : > { %2615 = vmatpush3.msra.mxu1 %v1460_v11  ;;  %v1593_v39 = vand.u32 4294901760, %v1592_v10  ;;  %2590 = vmatpush3.msra.mxu0 %v4111_v62  ;;  %v1481_v25 = vand.u32 4294901760, %v1480_v23  ;;  %v4923_v17 = vand.u32 4294901760, %v4205_v1  ;;  %v4752_v14 = vand.u32 4294901760, %v4251_v7 }
  0xd4   : > { %4920 = vst [vmem:[#allocation65_spill] sm:$0xff] %v4258_v19  ;;  %2616 = vmatprep.subr.mxu1 %v1579_v54  ;;  %v1487_v11 = vsub.f32 %v4135_v36, %v4921_v33  ;;  %v1399_v50 = vsub.f32 %v4197_v16, %v4922_v31  ;;  %2591 = vmatprep.subr.mxu0 %v4182_v24  ;;  %v1600_v54 = vand.u32 4294901760, %v1599_v41  ;;  %v4924_v33 = vand.u32 4294901760, %v4162_v51 }
  0xd5   : > { %2617 = vmatpush3.msra.mxu1 %v1467_v43  ;;  %v1606_v13 = vsub.f32 %v4205_v1, %v4923_v17  ;;  %2592 = vmatpush3.msra.mxu0 %v4171_v21  ;;  %v1394_v23 = vand.u32 4294901760, %v1393_v55  ;;  %v4925_v43 = vand.u32 4294901760, %v4225_v4  ;;  %v4753_v10 = vand.u32 4294901760, %v4258_v19 }
  0xd6   : > { %2618 = vmatprep.subr.mxu1 %v1586_v34  ;;  %v1494_v31 = vsub.f32 %v4162_v51, %v4924_v33  ;;  %2593 = vmatprep.subr.mxu0 %v4193_v40  ;;  %v1488_v34 = vand.u32 4294901760, %v1487_v11  ;;  %v1400_v41 = vand.u32 4294901760, %v1399_v50  ;;  %v4926_v24 = vand.u32 4294901760, %v4212_v42 }
  0xd7   : > { %2619 = vmatpush3.msra.mxu1 %v1474_v48  ;;  %v1613_v17 = vsub.f32 %v4225_v4, %v4925_v43  ;;  %2594 = vmatpush3.msra.mxu0 %v4201_v22  ;;  %v1607_v48 = vand.u32 4294901760, %v1606_v13  ;;  %v4927_v55 = vand.u32 4294901760, %v4242_v26  ;;  %v4928_v50 = vand.u32 4294901760, %v4235_v18 }
  0xd8   : > { %2620 = vmatprep.subr.mxu1 %v1593_v39  ;;  %v1501_v33 = vsub.f32 %v4212_v42, %v4926_v24  ;;  %2595 = vmatprep.subr.mxu0 %v4219_v35  ;;  %v1495_v39 = vand.u32 4294901760, %v1494_v31  ;;  %v1627_v13 = vsub.f32 %v4258_v19, %v4753_v10  ;;  %v4946_v10 = vld [vmem:[#allocation58_spill] sm:$0xff] }
  0xd9   : > { %2621 = vmatpush3.msra.mxu1 %v1481_v25  ;;  %v1620_v43 = vsub.f32 %v4242_v26, %v4927_v55  ;;  %v1508_v11 = vsub.f32 %v4235_v18, %v4928_v50  ;;  %2596 = vmatpush3.msra.mxu0 %v4221_v37  ;;  %v1614_v24 = vand.u32 4294901760, %v1613_v17  ;;  %v4932_v55 = vld [vmem:[#allocation40_spill] sm:$0xff]  ;;  %v4935_v50 = vld [vmem:[#allocation41_spill] sm:$0xff] }
  0xda   : > { %2622 = vmatprep.subr.mxu1 %v1600_v54  ;;  %1395 = vmatprep.mubr.f32.mxu0 %v1394_v23  ;;  %v1502_v25 = vand.u32 4294901760, %v1501_v33  ;;  %v1515_v54 = vsub.f32 %v4251_v7, %v4752_v14  ;;  %v1628_v17 = vand.u32 4294901760, %v1627_v13  ;;  %v4930_v33 = vld [vmem:[#allocation48_spill] sm:$0xff]  ;;  %v4945_v14 = vld [vmem:[#allocation49_spill] sm:$0xff] }
  0xdb   : > { %2623 = vmatpush3.msra.mxu1 %v1488_v34  ;;  %1401 = vmatmul.mubr.f32.vlgmr.msra.gmra.mxu0 %v1400_v41  ;;  %v1621_v31 = vand.u32 4294901760, %v1620_v43  ;;  %v1509_v23 = vand.u32 4294901760, %v1508_v11  ;;  %v4929_v41 = vld [vmem:[#allocation39_spill] sm:$0xff]  ;;  %v4933_v43 = vld [vmem:[#allocation57_spill] sm:$0xff]  ;;  %v4938_v13 = vld [vmem:[#allocation44_spill] sm:$0xff] }
  0xdc   : > { %2624 = vmatprep.subr.mxu1 %v1607_v48  ;;  %2635 = vmatprep.subr.mxu0 %v3854_v6  ;;  %v1516_v34 = vand.u32 4294901760, %v1515_v54  ;;  %v4931_v48 = vld [vmem:[#allocation54_spill] sm:$0xff]  ;;  %v4936_v11 = vld [vmem:[#allocation43_spill] sm:$0xff]  ;;  %v4940_v54 = vld [vmem:[#allocation45_spill] sm:$0xff] }
  0xdd   : > { %2625 = vmatpush3.msra.mxu1 %v1495_v39  ;;  %2636 = vmatpush3.msra.mxu0 %v3841_v38  ;;  %v4934_v39 = vld [vmem:[#allocation42_spill] sm:$0xff] }
  0xde   : > { %2626 = vmatprep.subr.mxu1 %v1614_v24  ;;  %2637 = vmatprep.subr.mxu0 %v3865_v29  ;;  %v4937_v24 = vld [vmem:[#allocation50_spill] sm:$0xff] }
  0xdf   : > { %2627 = vmatpush3.msra.mxu1 %v1502_v25  ;;  %2638 = vmatpush3.msra.mxu0 %v3849_v28  ;;  %v4939_v25 = vld [vmem:[#allocation46_spill] sm:$0xff] }
  0xe0   : > { %2628 = vmatprep.subr.mxu1 %v1621_v31  ;;  %2639 = vmatprep.subr.mxu0 %v3876_v61  ;;  %v4941_v31 = vld [vmem:[#allocation53_spill] sm:$0xff] }
  0xe1   : > { %2629 = vmatpush3.msra.mxu1 %v1509_v23  ;;  %2640 = vmatpush3.msra.mxu0 %v3882_v46  ;;  %v4942_v23 = vld [vmem:[#allocation47_spill] sm:$0xff] }
  0xe2   : > { %2630 = vmatprep.subr.mxu1 %v1628_v17  ;;  %2641 = vmatprep.subr.mxu0 %v3910_v8  ;;  %v4943_v17 = vld [vmem:[#allocation55_spill] sm:$0xff] }
  0xe3   : > { %2631 = vmatpush3.msra.mxu1 %v1516_v34  ;;  %1631 = vmatprep.mubr.f32.mxu1 %v4142_v2  ;;  %v4944_v34 = vld [vmem:[#allocation56_spill] sm:$0xff] }
  0xe4   : > { %2642 = vmatpush3.msra.mxu0 %v3895_v30  ;;  %1633 = vmatmul.mubr.f32.vlgmr.msra.gmra.mxu1 %v4153_v49  ;;  %v4947_v49 = vld [vmem:[#allocation38_spill] sm:$0xff]  ;;  %v4948_v2 = vld [vmem:[#allocation60_spill] sm:$0xff] }
  0xe5   : > { %2643 = vmatprep.subr.mxu0 %v3913_v52  ;;  %2670 = vmatprep.subr.mxu1 %v3825_v15 }
  0xe6   : > { %2644 = vmatpush3.msra.mxu0 %v3935_v60  ;;  %2671 = vmatpush3.msra.mxu1 %v3820_v58 }
  0xe7   : > { %2645 = vmatprep.subr.mxu0 %v3977_v27  ;;  %2672 = vmatprep.subr.mxu1 %v4929_v41 }
  0xe8   : > { %2646 = vmatpush3.msra.mxu0 %v4930_v33  ;;  %2673 = vmatpush3.msra.mxu1 %v4931_v48 }
  0xe9   : > { %2647 = vmatprep.subr.mxu0 %v4018_v63  ;;  %2674 = vmatprep.subr.mxu1 %v4932_v55 }
  0xea   : > { %2648 = vmatpush3.msra.mxu0 %v3982_v9  ;;  %2675 = vmatpush3.msra.mxu1 %v4933_v43 }
  0xeb   : > { %2649 = vmatprep.subr.mxu0 %v4041_v59  ;;  %2676 = vmatprep.subr.mxu1 %v4934_v39 }
  0xec   : > { %2650 = vmatpush3.msra.mxu0 %v4032_v12  ;;  %2677 = vmatpush3.msra.mxu1 %v4935_v50 }
  0xed   : > { %2651 = vmatprep.subr.mxu0 %v4098_v0  ;;  %2678 = vmatprep.subr.mxu1 %v4936_v11 }
  0xee   : > { %2652 = vmatpush3.msra.mxu0 %v4937_v24  ;;  %2679 = vmatpush3.msra.mxu1 %v4938_v13 }
  0xef   : > { %2653 = vmatprep.subr.mxu0 %v4124_v57  ;;  %2680 = vmatprep.subr.mxu1 %v4939_v25 }
  0xf0   : > { %2654 = vmatpush3.msra.mxu0 %v4069_v32  ;;  %2681 = vmatpush3.msra.mxu1 %v4940_v54 }
  0xf1   : > { %2655 = vmatprep.subr.mxu0 %v4151_v56  ;;  %2682 = vmatprep.subr.mxu1 %v4941_v31 }
  0xf2   : > { %2656 = vmatpush3.msra.mxu0 %v4120_v47  ;;  %2683 = vmatpush3.msra.mxu1 %v4942_v23 }
  0xf3   : > { %2657 = vmatprep.subr.mxu0 %v4175_v5  ;;  %2684 = vmatprep.subr.mxu1 %v4943_v17 }
  0xf4   : > { %2658 = vmatpush3.msra.mxu0 %v4135_v36  ;;  %2685 = vmatpush3.msra.mxu1 %v4944_v34 }
  0xf5   : > { %2659 = vmatprep.subr.mxu0 %v4205_v1  ;;  %2686 = vmatprep.subr.mxu1 %v4945_v14 }
  0xf6   : > { %2660 = vmatpush3.msra.mxu0 %v4162_v51  ;;  %2687 = vmatpush3.msra.mxu1 %v4946_v10 }
  0xf7   : > { %2661 = vmatprep.subr.mxu0 %v4225_v4  ;;  %2688 = vmatprep.subr.mxu1 %v4038_v53  ;;  %v4949_v53 = vld [vmem:[#allocation61_spill] sm:$0xff] }
  0xf8   : > { %2662 = vmatpush3.msra.mxu0 %v4212_v42  ;;  %2689 = vmatpush3.msra.mxu1 %v4947_v49 }
  0xf9   : > { %2663 = vmatprep.subr.mxu0 %v4242_v26  ;;  %2690 = vmatprep.subr.mxu1 %v4948_v2  ;;  %v4950_v2 = vand.u32 4294901760, %v3854_v6  ;;  %v4955_v6 = vand.u32 4294901760, %v3876_v61  ;;  %v4960_v61 = vand.u32 4294901760, %v4197_v16 }
  0xfa   : > { %2664 = vmatpush3.msra.mxu0 %v4235_v18  ;;  %2691 = vmatpush3.msra.mxu1 %v4076_v45  ;;  %v4951_v45 = vand.u32 4294901760, %v3841_v38  ;;  %v4956_v38 = vand.u32 4294901760, %v3882_v46  ;;  %v4962_v46 = vand.u32 4294901760, %v3935_v60  ;;  %v4968_v60 = vand.u32 4294901760, %v4032_v12 }
  0xfb   : > { %2665 = vmatprep.subr.mxu0 %v4258_v19  ;;  %2692 = vmatprep.subr.mxu1 %v4109_v20  ;;  %v4952_v19 = vld [vmem:[#allocation63_spill] sm:$0xff]  ;;  %v4975_v12 = vand.u32 4294901760, %v4175_v5  ;;  %v4979_v5 = vand.u32 4294901760, %v4225_v4 }
  0xfc   : > { %2666 = vmatpush3.msra.mxu0 %v4251_v7  ;;  %1768 = vmatprep.mubr.f32.mxu0 %v4185_v3  ;;  %v4953_v7 = vand.u32 4294901760, %v3865_v29  ;;  %v4957_v29 = vand.u32 4294901760, %v3910_v8  ;;  %v4963_v8 = vand.u32 4294901760, %v3977_v27  ;;  %v4972_v27 = vand.u32 4294901760, %v4069_v32 }
  0xfd   : > { %2693 = vmatpush3.msra.mxu1 %v4949_v53  ;;  %1771 = vmatmul.mubr.f32.vlgmr.msra.gmra.mxu0 %v4197_v16  ;;  %v4954_v53 = vand.u32 4294901760, %v3849_v28  ;;  %v4958_v28 = vand.u32 4294901760, %v4185_v3  ;;  %v4969_v3 = vand.u32 4294901760, %v4098_v0  ;;  %v4976_v16 = vand.u32 4294901760, %v4135_v36 }
  0xfe   : > { %2694 = vmatprep.subr.mxu1 %v4159_v44  ;;  %2705 = vmatprep.subr.mxu0 %v4950_v2  ;;  %v4961_v2 = vand.u32 4294901760, %v3913_v52  ;;  %v4965_v52 = vand.u32 4294901760, %v4018_v63  ;;  %v4974_v63 = vand.u32 4294901760, %v4120_v47  ;;  %v4977_v32 = vand.u32 4294901760, %v4205_v1  ;;  %v4980_v47 = vld [vmem:[#allocation62_spill] sm:$0xff]  ;;  %v4986_v1 = vld [vmem:[#allocation65_spill] sm:$0xff] }
  0xff   : > { %2695 = vmatpush3.msra.mxu1 %v4111_v62  ;;  %2706 = vmatpush3.msra.mxu0 %v4951_v45  ;;  %v4959_v45 = vand.u32 4294901760, %v3895_v30  ;;  %v4964_v30 = vand.u32 4294901760, %v4930_v33  ;;  %v4978_v0 = vand.u32 4294901760, %v4162_v51  ;;  %v4982_v36 = vand.u32 4294901760, %v4242_v26  ;;  %v4985_v51 = vld [vmem:[#allocation51_spill] sm:$0xff]  ;;  %v4991_v26 = vld [vmem:[#allocation61_spill] sm:$0xff] }
 0x100   : > { %2696 = vmatprep.subr.mxu1 %v4952_v19  ;;  %2707 = vmatprep.subr.mxu0 %v4953_v7  ;;  %v4987_v4 = vand.u32 4294901760, %v4986_v1 }
 0x101   : > { %2697 = vmatpush3.msra.mxu1 %v4171_v21  ;;  %2708 = vmatpush3.msra.mxu0 %v4954_v53  ;;  %v4970_v53 = vand.u32 4294901760, %v4937_v24 }
 0x102   : > { %2698 = vmatprep.subr.mxu1 %v4193_v40  ;;  %2709 = vmatprep.subr.mxu0 %v4955_v6 }
 0x103   : > { %2699 = vmatpush3.msra.mxu1 %v4201_v22  ;;  %2710 = vmatpush3.msra.mxu0 %v4956_v38 }
 0x104   : > { %2700 = vmatprep.subr.mxu1 %v4219_v35  ;;  %2711 = vmatprep.subr.mxu0 %v4957_v29 }
 0x105   : > { %2701 = vmatpush3.msra.mxu1 %v4221_v37  ;;  %1875 = vmatprep.mubr.f32.mxu1 %v4958_v28 }
 0x106   : > { %2712 = vmatpush3.msra.mxu0 %v4959_v45  ;;  %1879 = vmatmul.mubr.f32.vlgmr.msra.gmra.mxu1 %v4960_v61 }
 0x107   : > { %2713 = vmatprep.subr.mxu0 %v4961_v2  ;;  %2740 = vmatprep.subr.mxu1 %v3825_v15  ;;  %v4966_v15 = vand.u32 4294901760, %v3982_v9  ;;  %v4973_v9 = vand.u32 4294901760, %v4151_v56  ;;  %v4983_v56 = vld [vmem:[#allocation60_spill] sm:$0xff] }
 0x108   : > { %2714 = vmatpush3.msra.mxu0 %v4962_v46  ;;  %2741 = vmatpush3.msra.mxu1 %v3820_v58  ;;  %v4967_v58 = vand.u32 4294901760, %v4041_v59  ;;  %v4971_v59 = vand.u32 4294901760, %v4124_v57  ;;  %v4981_v57 = vand.u32 4294901760, %v4212_v42  ;;  %v4988_v42 = vld [vmem:[#allocation64_spill] sm:$0xff] }
 0x109   : > { %2715 = vmatprep.subr.mxu0 %v4963_v8  ;;  %2742 = vmatprep.subr.mxu1 %v4929_v41  ;;  %v4989_v7 = vand.u32 4294901760, %v4988_v42 }
 0x10a   : > { %2716 = vmatpush3.msra.mxu0 %v4964_v30  ;;  %2743 = vmatpush3.msra.mxu1 %v4931_v48 }
 0x10b   : > { %2717 = vmatprep.subr.mxu0 %v4965_v52  ;;  %2744 = vmatprep.subr.mxu1 %v4932_v55 }
 0x10c   : > { %2718 = vmatpush3.msra.mxu0 %v4966_v15  ;;  %2745 = vmatpush3.msra.mxu1 %v4933_v43 }
 0x10d   : > { %2719 = vmatprep.subr.mxu0 %v4967_v58  ;;  %2746 = vmatprep.subr.mxu1 %v4934_v39 }
 0x10e   : > { %2720 = vmatpush3.msra.mxu0 %v4968_v60  ;;  %2747 = vmatpush3.msra.mxu1 %v4935_v50 }
 0x10f   : > { %2721 = vmatprep.subr.mxu0 %v4969_v3  ;;  %2748 = vmatprep.subr.mxu1 %v4936_v11 }
 0x110   : > { %2722 = vmatpush3.msra.mxu0 %v4970_v53  ;;  %2749 = vmatpush3.msra.mxu1 %v4938_v13 }
 0x111   : > { %2723 = vmatprep.subr.mxu0 %v4971_v59  ;;  %2750 = vmatprep.subr.mxu1 %v4939_v25 }
 0x112   : > { %2724 = vmatpush3.msra.mxu0 %v4972_v27  ;;  %2751 = vmatpush3.msra.mxu1 %v4940_v54 }
 0x113   : > { %2725 = vmatprep.subr.mxu0 %v4973_v9  ;;  %2752 = vmatprep.subr.mxu1 %v4941_v31 }
 0x114   : > { %2726 = vmatpush3.msra.mxu0 %v4974_v63  ;;  %2753 = vmatpush3.msra.mxu1 %v4942_v23 }
 0x115   : > { %2727 = vmatprep.subr.mxu0 %v4975_v12  ;;  %2754 = vmatprep.subr.mxu1 %v4943_v17 }
 0x116   : > { %2728 = vmatpush3.msra.mxu0 %v4976_v16  ;;  %2755 = vmatpush3.msra.mxu1 %v4944_v34 }
 0x117   : > { %2729 = vmatprep.subr.mxu0 %v4977_v32  ;;  %2756 = vmatprep.subr.mxu1 %v4945_v14  ;;  %v4984_v14 = vand.u32 4294901760, %v4235_v18 }
 0x118   : > { %2730 = vmatpush3.msra.mxu0 %v4978_v0  ;;  %2757 = vmatpush3.msra.mxu1 %v4946_v10  ;;  %v4992_v10 = vld [vmem:[#allocation59_spill] sm:$0xff] }
 0x119   : > { %2731 = vmatprep.subr.mxu0 %v4979_v5  ;;  %2758 = vmatprep.subr.mxu1 %v4980_v47 }
 0x11a   : > { %2732 = vmatpush3.msra.mxu0 %v4981_v57  ;;  %2759 = vmatpush3.msra.mxu1 %v4947_v49  ;;  %v4990_v49 = vld [vmem:[#allocation52_spill] sm:$0xff] }
 0x11b   : > { %2733 = vmatprep.subr.mxu0 %v4982_v36  ;;  %2760 = vmatprep.subr.mxu1 %v4983_v56 }
 0x11c   : > { %2734 = vmatpush3.msra.mxu0 %v4984_v14  ;;  %2761 = vmatpush3.msra.mxu1 %v4985_v51 }
 0x11d   : > { %2735 = vmatprep.subr.mxu0 %v4987_v4  ;;  %2762 = vmatprep.subr.mxu1 %v4109_v20 }
 0x11e   : > { %2736 = vmatpush3.msra.mxu0 %v4989_v7  ;;  %2045 = vmatprep.mubr.f32.mxu0 %v4990_v49 }
 0x11f   : > { %2763 = vmatpush3.msra.mxu1 %v4991_v26  ;;  %2047 = vmatmul.mubr.f32.vlgmr.msra.gmra.mxu0 %v4992_v10 }
 0x120   : > { %2764 = vmatprep.subr.mxu1 %v4159_v44  ;;  %2149 = vmatprep.mubr.f32.mxu1 %v4990_v49 }
 0x121   : > { %2765 = vmatpush3.msra.mxu1 %v4111_v62 }
 0x122   : > { %2766 = vmatprep.subr.mxu1 %v4952_v19 }
 0x123   : > { %2767 = vmatpush3.msra.mxu1 %v4171_v21 }
 0x124   : > { %2768 = vmatprep.subr.mxu1 %v4193_v40 }
 0x125   : > { %2769 = vmatpush3.msra.mxu1 %v4201_v22 }
 0x126   : > { %2770 = vmatprep.subr.mxu1 %v4219_v35 }
 0x127   : > { %2771 = vmatpush3.msra.mxu1 %v4221_v37 }
 0x128   : > { %2151 = vmatmul.mubr.f32.vlgmr.msra.gmra.mxu1 %v4992_v10 }
 0x129   : > { %2899 = shalt.err (!%p2896_p8)  }
 0x12a   : > { %s2900_s26 = scalar_lea.vmem %s223_s11, 16  ;;  %s2902_s24 = sshll.u32 %s4625_s5, 4  ;;  %s4510_s24 = int_to_ptr.vmem [resolvable:$false] %s2902_s24 }
 0x12b   : > { %p2901_p9 = scmp.ne.s32.totalorder %s223_s11, %s2900_s26  ;;  %s4513_s8 = scalar_lea.vmem %s4510_s24, 512 }
 0x12c   : > { %p2905_p10 = scmp.lt.s32.totalorder %s223_s11, %s4510_s24  ;;  %p2906_p11 = scmp.lt.s32.totalorder %s4513_s8, %s2900_s26 }
 0x12e   : > { %p2907_p13 = por %p2906_p11, %p2905_p10 }
 0x130   : > { %p2908_p0 = pnand %p2907_p13, %p2901_p9 }
 0x132   : > { %2911 = shalt.err (!%p2908_p0)  }
 0x133   : > { %225 = dma.hbm_to_vmem [thread:$0]  %s213_s15, 16, %s223_s11, [#allocation2] }
 0x134   : > { %s2336_s10 = sshll.u32 %s4482_s20, 4  ;;  %s239_s12 = sshll.u32 %s230_s9, 4  ;;  %s240_s12 = int_to_ptr.vmem [resolvable:$true] %s239_s12 }
 0x135   : > { %s229_s16 = scalar_lea.hbm %s4624_s4, %s2336_s10 }
 0x136   : > { %s2912_s17 = scalar_lea.hbm %s229_s16, 16  ;;  %p2915_p1 = scmp.lt.s32.totalorder %s229_s16, %s4624_s4 }
 0x137   : > { %p2913_p12 = scmp.ne.s32.totalorder %s229_s16, %s2912_s17  ;;  %p2916_p4 = scmp.lt.s32.totalorder %s4501_s18, %s2912_s17 }
 0x139   : > { %p2917_p5 = por %p2916_p4, %p2915_p1 }
 0x13b   : > { %p2918_p7 = pnand %p2917_p5, %p2913_p12 }
 0x13d   : > { %2921 = shalt.err (!%p2918_p7)  }
 0x13e   : > { %s2922_s11 = scalar_lea.vmem %s240_s12, 16  ;;  %p2927_p3 = scmp.lt.s32.totalorder %s240_s12, %s4510_s24 }
 0x13f   : > { %p2923_p2 = scmp.ne.s32.totalorder %s240_s12, %s2922_s11  ;;  %p2928_p6 = scmp.lt.s32.totalorder %s4513_s8, %s2922_s11 }
 0x141   : > { %p2929_p8 = por %p2928_p6, %p2927_p3 }
 0x143   : > { %p2930_p9 = pnand %p2929_p8, %p2923_p2 }
 0x145   : > { %2933 = shalt.err (!%p2930_p9)  }
 0x146   : > { %242 = dma.hbm_to_vmem [thread:$0]  %s229_s16, 16, %s240_s12, [#allocation2 + $0x1] }
 0x147   : > { %s2337_s20 = sshll.u32 %s4485_s28, 4  ;;  %s247_s9 = scalar_lea.vmem %s4490_s6, 3 }
 0x148   : > { %s246_s27 = scalar_lea.hbm %s4624_s4, %s2337_s20  ;;  %s256_s29 = sshll.u32 %s247_s9, 4  ;;  %s257_s29 = int_to_ptr.vmem [resolvable:$true] %s256_s29 }
 0x149   : > { %s261_s10 = sld [smem:[#allocation4 + %s260_s7]]  ;;  %s2934_s14 = scalar_lea.hbm %s246_s27, 16 }
 0x14a   : > { %p2935_p10 = scmp.ne.s32.totalorder %s246_s27, %s2934_s14  ;;  %p2937_p11 = scmp.lt.s32.totalorder %s246_s27, %s4624_s4 }
 0x14b   : > { %p2938_p13 = scmp.lt.s32.totalorder %s4501_s18, %s2934_s14 }
 0x14d   : > { %p2939_p0 = por %p2938_p13, %p2937_p11 }
 0x14f   : > { %p2940_p12 = pnand %p2939_p0, %p2935_p10 }
 0x151   : > { %2943 = shalt.err (!%p2940_p12)  }
 0x152   : > { %s2944_s28 = scalar_lea.vmem %s257_s29, 16  ;;  %p2949_p4 = scmp.lt.s32.totalorder %s257_s29, %s4510_s24 }
 0x153   : > { %p2945_p1 = scmp.ne.s32.totalorder %s257_s29, %s2944_s28  ;;  %p2950_p5 = scmp.lt.s32.totalorder %s4513_s8, %s2944_s28 }
 0x155   : > { %p2951_p7 = por %p2950_p5, %p2949_p4 }
 0x157   : > { %p2952_p2 = pnand %p2951_p7, %p2945_p1 }
 0x159   : > { %2955 = shalt.err (!%p2952_p2)  }
 0x15a   : > { %259 = dma.hbm_to_vmem [thread:$0]  %s246_s27, 16, %s257_s29, [#allocation2 + $0x2] }
 0x15b   : > { %s264_s7 = scalar_lea.vmem %s4490_s6, 4  ;;  %s277_s12 = sadd.s32 4, %s4477_s25 }
 0x15c   : > { %s273_s16 = sshll.u32 %s264_s7, 4  ;;  %s278_s19 = sld [smem:[#allocation4 + %s277_s12]]  ;;  %s274_s16 = int_to_ptr.vmem [resolvable:$true] %s273_s16 }
 0x15d   : > { %s281_s21 = scalar_lea.vmem %s4490_s6, 5  ;;  %s294_s20 = sadd.s32 5, %s4477_s25 }
 0x15e   : > { %s290_s11 = sshll.u32 %s281_s21, 4  ;;  %s2338_s9 = sshll.u32 %s261_s10, 4  ;;  %s4544_s11 = int_to_ptr.vmem [resolvable:$true] %s290_s11 }
 0x15f   : > { %s263_s27 = scalar_lea.hbm %s4624_s4, %s2338_s9  ;;  %s4549_s29 = sld [smem:[#allocation4 + %s294_s20]] }
 0x160   : > { %s2956_s14 = scalar_lea.hbm %s263_s27, 16  ;;  %p2959_p6 = scmp.lt.s32.totalorder %s263_s27, %s4624_s4 }
 0x161   : > { %p2957_p3 = scmp.ne.s32.totalorder %s263_s27, %s2956_s14  ;;  %p2960_p8 = scmp.lt.s32.totalorder %s4501_s18, %s2956_s14 }
 0x163   : > { %p2961_p9 = por %p2960_p8, %p2959_p6 }
 0x165   : > { %p2962_p10 = pnand %p2961_p9, %p2957_p3 }
 0x167   : > { %2965 = shalt.err (!%p2962_p10)  }
 0x168   : > { %s2966_s28 = scalar_lea.vmem %s274_s16, 16  ;;  %p2971_p13 = scmp.lt.s32.totalorder %s274_s16, %s4510_s24 }
 0x169   : > { %p2967_p11 = scmp.ne.s32.totalorder %s274_s16, %s2966_s28  ;;  %p2972_p0 = scmp.lt.s32.totalorder %s4513_s8, %s2966_s28 }
 0x16b   : > { %p2973_p12 = por %p2972_p0, %p2971_p13 }
 0x16d   : > { %p2974_p1 = pnand %p2973_p12, %p2967_p11 }
 0x16f   : > { %2977 = shalt.err (!%p2974_p1)  }
 0x170   : > { %276 = dma.hbm_to_vmem [thread:$0]  %s263_s27, 16, %s274_s16, [#allocation2 + $0x3] }
 0x171   : > { %s2339_s10 = sshll.u32 %s278_s19, 4  ;;  %s298_s7 = scalar_lea.vmem %s4490_s6, 6 }
 0x172   : > { %s280_s20 = scalar_lea.hbm %s4624_s4, %s2339_s10  ;;  %s307_s9 = sshll.u32 %s298_s7, 4  ;;  %s308_s9 = int_to_ptr.vmem [resolvable:$true] %s307_s9 }
 0x173   : > { %s2978_s15 = scalar_lea.hbm %s280_s20, 16  ;;  %p2981_p5 = scmp.lt.s32.totalorder %s280_s20, %s4624_s4 }
 0x174   : > { %p2979_p4 = scmp.ne.s32.totalorder %s280_s20, %s2978_s15  ;;  %p2982_p7 = scmp.lt.s32.totalorder %s4501_s18, %s2978_s15 }
 0x176   : > { %p2983_p2 = por %p2982_p7, %p2981_p5 }
 0x178   : > { %p2984_p3 = pnand %p2983_p2, %p2979_p4 }
 0x17a   : > { %2987 = shalt.err (!%p2984_p3)  }
 0x17b   : > { %s2988_s16 = scalar_lea.vmem %s4544_s11, 16  ;;  %p2993_p8 = scmp.lt.s32.totalorder %s4544_s11, %s4510_s24 }
 0x17c   : > { %p2989_p6 = scmp.ne.s32.totalorder %s4544_s11, %s2988_s16  ;;  %p2994_p9 = scmp.lt.s32.totalorder %s4513_s8, %s2988_s16 }
 0x17e   : > { %p2995_p10 = por %p2994_p9, %p2993_p8 }
 0x180   : > { %p2996_p11 = pnand %p2995_p10, %p2989_p6 }
 0x182   : > { %2999 = shalt.err (!%p2996_p11)  }
 0x183   : > { %293 = dma.hbm_to_vmem [thread:$0]  %s280_s20, 16, %s4544_s11, [#allocation2 + $0x4] }
 0x184   : > { %s311_s19 = sadd.s32 6, %s4477_s25  ;;  %s2340_s27 = sshll.u32 %s4549_s29, 4 }
 0x185   : > { %s312_s0 = sld [smem:[#allocation4 + %s311_s19]]  ;;  %s297_s10 = scalar_lea.hbm %s4624_s4, %s2340_s27 }
 0x186   : > { %s315_s7 = scalar_lea.vmem %s4490_s6, 7  ;;  %s3000_s12 = scalar_lea.hbm %s297_s10, 16 }
 0x187   : > { %p3001_p13 = scmp.ne.s32.totalorder %s297_s10, %s3000_s12  ;;  %p3003_p0 = scmp.lt.s32.totalorder %s297_s10, %s4624_s4 }
 0x188   : > { %p3004_p12 = scmp.lt.s32.totalorder %s4501_s18, %s3000_s12 }
 0x18a   : > { %p3005_p1 = por %p3004_p12, %p3003_p0 }
 0x18c   : > { %p3006_p4 = pnand %p3005_p1, %p3001_p13 }
 0x18e   : > { %3009 = shalt.err (!%p3006_p4)  }
 0x18f   : > { %s3010_s11 = scalar_lea.vmem %s308_s9, 16  ;;  %p3015_p7 = scmp.lt.s32.totalorder %s308_s9, %s4510_s24 }
 0x190   : > { %p3011_p5 = scmp.ne.s32.totalorder %s308_s9, %s3010_s11  ;;  %p3016_p2 = scmp.lt.s32.totalorder %s4513_s8, %s3010_s11 }
 0x192   : > { %p3017_p3 = por %p3016_p2, %p3015_p7 }
 0x194   : > { %p3018_p6 = pnand %p3017_p3, %p3011_p5 }
 0x196   : > { %3021 = shalt.err (!%p3018_p6)  }
 0x197   : > { %310 = dma.hbm_to_vmem [thread:$0]  %s297_s10, 16, %s308_s9, [#allocation2 + $0x5] }
 0x198   : > { %s324_s29 = sshll.u32 %s315_s7, 4  ;;  %s328_s20 = sadd.s32 7, %s4477_s25  ;;  %s325_s29 = int_to_ptr.vmem [resolvable:$true] %s324_s29 }
 0x199   : > { %s329_s26 = sld [smem:[#allocation4 + %s328_s20]]  ;;  %s332_s14 = scalar_lea.vmem %s4490_s6, 8 }
 0x19a   : > { %s2341_s16 = sshll.u32 %s312_s0, 4  ;;  %s341_s19 = sshll.u32 %s332_s14, 4  ;;  %s342_s19 = int_to_ptr.vmem [resolvable:$true] %s341_s19 }
 0x19b   : > { %s314_s28 = scalar_lea.hbm %s4624_s4, %s2341_s16 }
 0x19c   : > { %s3022_s12 = scalar_lea.hbm %s314_s28, 16  ;;  %p3025_p9 = scmp.lt.s32.totalorder %s314_s28, %s4624_s4 }
 0x19d   : > { %p3023_p8 = scmp.ne.s32.totalorder %s314_s28, %s3022_s12  ;;  %p3026_p10 = scmp.lt.s32.totalorder %s4501_s18, %s3022_s12 }
 0x19f   : > { %p3027_p11 = por %p3026_p10, %p3025_p9 }
 0x1a1   : > { %p3028_p13 = pnand %p3027_p11, %p3023_p8 }
 0x1a3   : > { %3031 = shalt.err (!%p3028_p13)  }
 0x1a4   : > { %s3032_s25 = scalar_lea.vmem %s325_s29, 16  ;;  %p3037_p12 = scmp.lt.s32.totalorder %s325_s29, %s4510_s24 }
 0x1a5   : > { %p3033_p0 = scmp.ne.s32.totalorder %s325_s29, %s3032_s25  ;;  %p3038_p1 = scmp.lt.s32.totalorder %s4513_s8, %s3032_s25 }
 0x1a7   : > { %p3039_p4 = por %p3038_p1, %p3037_p12 }
 0x1a9   : > { %p3040_p5 = pnand %p3039_p4, %p3033_p0 }
 0x1ab   : > { %3043 = shalt.err (!%p3040_p5)  }
 0x1ac   : > { %327 = dma.hbm_to_vmem [thread:$0]  %s314_s28, 16, %s325_s29, [#allocation2 + $0x6] }
 0x1ad   : > { %s2342_s9 = sshll.u32 %s329_s26, 4 }
 0x1ae   : > { %s331_s7 = scalar_lea.hbm %s4624_s4, %s2342_s9 }
 0x1af   : > { %s3044_s11 = scalar_lea.hbm %s331_s7, 16  ;;  %p3047_p2 = scmp.lt.s32.totalorder %s331_s7, %s4624_s4 }
 0x1b0   : > { %p3045_p7 = scmp.ne.s32.totalorder %s331_s7, %s3044_s11  ;;  %p3048_p3 = scmp.lt.s32.totalorder %s4501_s18, %s3044_s11 }
 0x1b2   : > { %p3049_p6 = por %p3048_p3, %p3047_p2 }
 0x1b4   : > { %p3050_p8 = pnand %p3049_p6, %p3045_p7 }
 0x1b6   : > { %3053 = shalt.err (!%p3050_p8)  }
 0x1b7   : > { %s3054_s16 = scalar_lea.vmem %s342_s19, 16  ;;  %p3059_p10 = scmp.lt.s32.totalorder %s342_s19, %s4510_s24 }
 0x1b8   : > { %p3055_p9 = scmp.ne.s32.totalorder %s342_s19, %s3054_s16  ;;  %p3060_p11 = scmp.lt.s32.totalorder %s4513_s8, %s3054_s16 }
 0x1ba   : > { %p3061_p13 = por %p3060_p11, %p3059_p10 }
 0x1bc   : > { %p3062_p0 = pnand %p3061_p13, %p3055_p9 }
 0x1be   : > { %3065 = shalt.err (!%p3062_p0)  }
 0x1bf   : > { %344 = dma.hbm_to_vmem [thread:$0]  %s331_s7, 16, %s342_s19, [#allocation2 + $0x7]  ;;  %v2387_v20 = vpop.f32.mrf.mxu0  ;;  %v2422_v44 = vpop.f32.mrf.mxu1  ;;  %v410_v41 = vld [vmem:[%s4623_s3] sm:$0x1] }
 0x1c1   : > { %v2388_v62 = vpop.f32.mrf.mxu0  ;;  %v2423_v40 = vpop.f32.mrf.mxu1 }
 0x1c2   : > { %v2389_v19 = vadd.f32 %v2388_v62, %v2387_v20  ;;  %v2424_v39 = vadd.f32 %v2423_v40, %v2422_v44 }
 0x1c3   : > { %v2457_v21 = vpop.f32.mrf.mxu0  ;;  %v2492_v37 = vpop.f32.mrf.mxu1 }
 0x1c4   : > { %v541_v43 = vadd.f32 %v2389_v19, %v410_v41 }
 0x1c5   : > { %v2458_v22 = vpop.f32.mrf.mxu0  ;;  %v2493_v18 = vpop.f32.mrf.mxu1 }
 0x1c6   : > { %v2459_v11 = vadd.f32 %v2458_v22, %v2457_v21  ;;  %v773_v25 = vadd.f32 %v2424_v39, %v541_v43  ;;  %v2494_v54 = vadd.f32 %v2493_v18, %v2492_v37 }
 0x1c7   : > { %v2527_v35 = vpop.f32.mrf.mxu0  ;;  %v2562_v48 = vpop.f32.mrf.mxu1 }
 0x1c8   : > { %v911_v23 = vadd.f32 %v2459_v11, %v773_v25 }
 0x1c9   : > { %v2528_v33 = vpop.f32.mrf.mxu0  ;;  %v2563_v50 = vpop.f32.mrf.mxu1 }
 0x1ca   : > { %v2529_v17 = vadd.f32 %v2528_v33, %v2527_v35  ;;  %v1019_v6 = vadd.f32 %v2494_v54, %v911_v23  ;;  %v2564_v38 = vadd.f32 %v2563_v50, %v2562_v48 }
 0x1cb   : > { %v2597_v55 = vpop.f32.mrf.mxu0  ;;  %v2632_v13 = vpop.f32.mrf.mxu1 }
 0x1cc   : > { %v1187_v45 = vadd.f32 %v2529_v17, %v1019_v6 }
 0x1cd   : > { %v2598_v24 = vpop.f32.mrf.mxu0  ;;  %v2633_v34 = vpop.f32.mrf.mxu1 }
 0x1ce   : > { %v2599_v61 = vadd.f32 %v2598_v24, %v2597_v55  ;;  %v1291_v46 = vadd.f32 %v2564_v38, %v1187_v45  ;;  %v2634_v8 = vadd.f32 %v2633_v34, %v2632_v13 }
 0x1cf   : > { %v2667_v31 = vpop.f32.mrf.mxu0  ;;  %v2702_v28 = vpop.f32.mrf.mxu1 }
 0x1d0   : > { %v1403_v52 = vadd.f32 %v2599_v61, %v1291_v46 }
 0x1d1   : > { %v2668_v29 = vpop.f32.mrf.mxu0  ;;  %v2703_v30 = vpop.f32.mrf.mxu1 }
 0x1d2   : > { %v2669_v15 = vadd.f32 %v2668_v29, %v2667_v31  ;;  %v1635_v60 = vadd.f32 %v2634_v8, %v1403_v52  ;;  %v2704_v3 = vadd.f32 %v2703_v30, %v2702_v28 }
 0x1d4   : > { %v1773_v53 = vadd.f32 %v2669_v15, %v1635_v60 }
 0x1d6   : > { %v1881_v9 = vadd.f32 %v2704_v3, %v1773_v53 }
 0x1df   : > { %v2737_v2 = vpop.f32.mrf.mxu0 }
 0x1e1   : > { %v2738_v58 = vpop.f32.mrf.mxu0 }
 0x1e2   : > { %v2739_v59 = vadd.f32 %v2738_v58, %v2737_v2 }
 0x1e4   : > { %v2049_v12 = vadd.f32 %v2739_v59, %v1881_v9 }
 0x1e8   : > { %v2772_v27 = vpop.f32.mrf.mxu1 }
 0x1ea   : > { %v2773_v63 = vpop.f32.mrf.mxu1 }
 0x1eb   : > { %v2774_v16 = vadd.f32 %v2773_v63, %v2772_v27 }
 0x1ed   : > { %v2153_v32 = vadd.f32 %v2774_v16, %v2049_v12 }
 0x1ef   : > { %2156 = vst [vmem:[%s4490_s6] sm:$0x1] %v2153_v32 }
 0x1f0   : > { %3092 = dma.done.wait [#allocation2], 16 }
 0x1f1   : > { %3093 = vsyncadd [#allocation2], 4294967280 }
 0x1f2   : > { %3094 = dma.done.wait [#allocation2 + $0x1], 16 }
 0x1f3   : > { %3095 = vsyncadd [#allocation2 + $0x1], 4294967280 }
 0x1f4   : > { %3096 = dma.done.wait [#allocation2 + $0x2], 16 }
 0x1f5   : > { %3097 = vsyncadd [#allocation2 + $0x2], 4294967280 }
 0x1f6   : > { %3098 = dma.done.wait [#allocation2 + $0x3], 16 }
 0x1f7   : > { %3099 = vsyncadd [#allocation2 + $0x3], 4294967280 }
 0x1f8   : > { %3100 = dma.done.wait [#allocation2 + $0x4], 16 }
 0x1f9   : > { %3101 = vsyncadd [#allocation2 + $0x4], 4294967280 }
 0x1fa   : > { %3102 = dma.done.wait [#allocation2 + $0x5], 16 }
 0x1fb   : > { %3103 = vsyncadd [#allocation2 + $0x5], 4294967280 }
 0x1fc   : > { %3104 = dma.done.wait [#allocation2 + $0x6], 16 }
 0x1fd   : > { %3105 = vsyncadd [#allocation2 + $0x6], 4294967280 }
 0x1fe   : > { %3106 = dma.done.wait [#allocation2 + $0x7], 16 }
 0x1ff   : > { %3107 = vsyncadd [#allocation2 + $0x7], 4294967280 }
 0x200 PF: > { %p20_p12 = scmp.ge.s32.totalorder %s3206_s30, 4   ;;  %s4993_s21 = smov %s3114_s22 }
 0x201   : > { %s4994_s22 = smov %s3118_s23  ;;  %s4995_s23 = smov %s3223_s13 }
 0x202   : > { %s4996_s24 = smov %s3206_s30  ;;  %22 = sbr.rel (!%p20_p12) target bundleno = 9 (0x9), region = 138 }
 0x207   :  { %2195 = vsyncpa [#allocation6], 1 }
 0x208   :  { %2197 = vsyncpa [#allocation6 + $0x1], 1 }
 0x209   :  { %2198 = vsyncpa [#allocation8], 1 }
 0x20a   :  { %2199 = vsyncmov [#allocation2] }
 0x20d   :  { %s2200_s6 = vpop.sfrf %2199 }
 0x20e   :  { %p2345_p1 = scmp.ne.s32.totalorder %s2200_s6, 0 }
 0x210   :  { %2204 = shalt.err (%p2345_p1)  }
 0x211   :  { %2206 = vsyncmov [#allocation2 + $0x1] }
 0x214   :  { %s2207_s24 = vpop.sfrf %2206 }
 0x215   :  { %p2346_p4 = scmp.ne.s32.totalorder %s2207_s24, 0 }
 0x217   :  { %2211 = shalt.err (%p2346_p4)  }
 0x218   :  { %2213 = vsyncmov [#allocation2 + $0x2] }
 0x21b   :  { %s2214_s8 = vpop.sfrf %2213 }
 0x21c   :  { %p2347_p5 = scmp.ne.s32.totalorder %s2214_s8, 0 }
 0x21e   :  { %2218 = shalt.err (%p2347_p5)  }
 0x21f   :  { %2220 = vsyncmov [#allocation2 + $0x3] }
 0x222   :  { %s2221_s13 = vpop.sfrf %2220 }
 0x223   :  { %p2348_p7 = scmp.ne.s32.totalorder %s2221_s13, 0 }
 0x225   :  { %2225 = shalt.err (%p2348_p7)  }
 0x226   :  { %2227 = vsyncmov [#allocation2 + $0x4] }
 0x229   :  { %s2228_s1 = vpop.sfrf %2227 }
 0x22a   :  { %p2349_p2 = scmp.ne.s32.totalorder %s2228_s1, 0 }
 0x22c   :  { %2232 = shalt.err (%p2349_p2)  }
 0x22d   :  { %2234 = vsyncmov [#allocation2 + $0x5] }
 0x230   :  { %s2235_s2 = vpop.sfrf %2234 }
 0x231   :  { %p2350_p3 = scmp.ne.s32.totalorder %s2235_s2, 0 }
 0x233   :  { %2239 = shalt.err (%p2350_p3)  }
 0x234   :  { %2241 = vsyncmov [#allocation2 + $0x6] }
 0x237   :  { %s2242_s3 = vpop.sfrf %2241 }
 0x238   :  { %p2351_p6 = scmp.ne.s32.totalorder %s2242_s3, 0 }
 0x23a   :  { %2246 = shalt.err (%p2351_p6)  }
 0x23b   :  { %2248 = vsyncmov [#allocation2 + $0x7] }
 0x23e   :  { %s2249_s4 = vpop.sfrf %2248 }
 0x23f   :  { %p2352_p8 = scmp.ne.s32.totalorder %s2249_s4, 0 }
 0x241   :  { %2253 = shalt.err (%p2352_p8)  }

</bundles_post_ra>
